<compile_context>
chip_gen: v7x
topology: tpu7x:2x2x1
jax: 0.10.0
libtpu: 0.0.40
codegen_flags: <defaults>
</compile_context>

<pallas_src>
import math

import jax
import jax.numpy as jnp
from jax import lax
from jax.experimental import pallas as pl
from jax.experimental.pallas import tpu as pltpu


# ----------------------------- model hyper-params (small, synthetic) ----------
BS       = 2          # batch size
NTILES   = 4          # tiles per sample (seq length for attention)
C, H, W  = 3, 16, 16  # per-tile image shape (NCHW)
OUT_FEAT = 128        # backbone.fc.in_features stand-in (2048 in real ResNeXt50)
NINP     = 64         # attention embedding dim (512 in the original module)
NHEAD    = 4          # attention heads (8 in the original module)
HEAD_DIM = NINP // NHEAD
NUM_CLASSES = [5, 7]  # one classifier head per entry
G        = len(NUM_CLASSES)

BN   = BS * NTILES    # total tokens
DIN  = C * H * W      # flattened tile size
CPAD = 128            # lane-dense padded class dimension
NEG_INF = -1e30


# ----------------------------- fused kernel -----------------------------------
def _fused_network_kernel(x_ref, wbb_ref, bbb_ref, pool_ref, bias_ref,
                          wq_ref, bq_ref, wk_ref, bk_ref, wv_ref, bv_ref,
                          woc_ref, boc_ref, o_ref):
    f32 = jnp.float32

    # backbone stand-in: flatten + linear (bf16 on the MXU, f32 accumulate)
    feats = jnp.dot(x_ref[...], wbb_ref[...],
                    preferred_element_type=f32) + bbb_ref[...]          # (BN, F)

    # fused (in_linear ∘ q/k/v) projections, batched over attention heads
    feats_h = jnp.broadcast_to(feats[None], (NHEAD, BN, OUT_FEAT))      # (NH, BN, F)
    dn_proj = (((2,), (1,)), ((0,), (0,)))   # contract feature dim, batch head dim
    q = lax.dot_general(feats_h, wq_ref[...], dn_proj,
                        preferred_element_type=f32) + bq_ref[...]       # (NH, BN, HD)
    k = lax.dot_general(feats_h, wk_ref[...], dn_proj,
                        preferred_element_type=f32) + bk_ref[...]
    v = lax.dot_general(feats_h, wv_ref[...], dn_proj,
                        preferred_element_type=f32) + bv_ref[...]

    # attention scores q.kT via contracting dims (no transposes materialized)
    s = lax.dot_general(q, k, (((2,), (2,)), ((0,), (0,))),
                        preferred_element_type=f32)                     # (NH, BN, BN)
    s = s + bias_ref[...][None]          # block-diagonal mask keeps samples separate

    m = jnp.max(s, axis=-1, keepdims=True)
    p = jnp.exp(s - m)
    p = p * pl.reciprocal(jnp.sum(p, axis=-1, keepdims=True), approx=True)

    attn = lax.dot_general(p, v, (((2,), (1,)), ((0,), (0,))),
                           preferred_element_type=f32)                  # (NH, BN, HD)

    # folded out_proj @ classifier per attention-head slice, summed over heads
    z = lax.dot_general(attn, woc_ref[...], (((2,), (1,)), ((0,), (0,))),
                        preferred_element_type=f32)                     # (NH, BN, CPAD)
    z = jnp.sum(z, axis=0)                                              # (BN, CPAD)

    # mean over tiles (pooling matmul) + folded bias (padded lanes = -1e30)
    logits = jnp.dot(pool_ref[...], z,
                     preferred_element_type=f32) + boc_ref[...]         # (BS, CPAD)

    # log_softmax over (padded) class dim; padded lanes underflow to prob 0
    zc = logits - jnp.max(logits, axis=-1, keepdims=True)
    lse = jnp.log(jnp.sum(jnp.exp(zc), axis=-1, keepdims=True))
    o_ref[...] = zc - lse


def _fused_forward(x_flat, packed):
    def full(*shape):
        return pl.BlockSpec(shape, lambda g, _s=shape: (0,) * len(_s))

    def per_head(*shape):
        return pl.BlockSpec((pl.Squeezed(),) + shape,
                            lambda g, _s=shape: (g,) + (0,) * len(_s))

    return pl.pallas_call(
        _fused_network_kernel,
        out_shape=jax.ShapeDtypeStruct((G, BS, CPAD), jnp.float32),
        grid=(G,),
        in_specs=[
            full(BN, DIN),                          # x_flat (bf16)
            full(DIN, OUT_FEAT),                    # backbone weight (bf16)
            full(1, OUT_FEAT),                      # backbone bias
            full(BS, BN),                           # tile-mean pooling matrix
            full(BN, BN),                           # block-diagonal attention mask
            per_head(NHEAD, OUT_FEAT, HEAD_DIM),    # Wq (in_linear + scale folded)
            per_head(NHEAD, 1, HEAD_DIM),           # bq
            per_head(NHEAD, OUT_FEAT, HEAD_DIM),    # Wk
            per_head(NHEAD, 1, HEAD_DIM),           # bk
            per_head(NHEAD, OUT_FEAT, HEAD_DIM),    # Wv
            per_head(NHEAD, 1, HEAD_DIM),           # bv
            per_head(NHEAD, HEAD_DIM, CPAD),        # out_proj @ classifier (padded)
            per_head(1, CPAD),                      # folded bias (-1e30 in padding)
        ],
        out_specs=per_head(BS, CPAD),
        compiler_params=pltpu.CompilerParams(dimension_semantics=("parallel",)),
    )(x_flat,
      packed["wbb"], packed["bbb"], packed["pool"], packed["attn_bias"],
      packed["wq"], packed["bq"], packed["wk"], packed["bk"],
      packed["wv"], packed["bv"], packed["woc"], packed["boc"])


# ----------------------------- one-time weight packing -------------------------
def pack_params(params):
    """Re-orient / fold / pad the PyTorch-shaped weights once, outside jit."""
    scale = 1.0 / math.sqrt(HEAD_DIM)

    packed = {
        "wbb": params["backbone_w"].T.astype(jnp.bfloat16),                 # (DIN, F)
        "bbb": params["backbone_b"].reshape(1, OUT_FEAT).astype(jnp.float32),
        "pool": (jnp.kron(jnp.eye(BS, dtype=jnp.float32),
                          jnp.ones((1, NTILES), jnp.float32)) / NTILES),    # (BS, BN)
    }
    owner = jnp.arange(BN, dtype=jnp.int32) // NTILES
    packed["attn_bias"] = jnp.where(owner[:, None] == owner[None, :],
                                    0.0, NEG_INF).astype(jnp.float32)       # (BN, BN)

    wq, bq, wk, bk, wv, bv, woc, boc = ([] for _ in range(8))
    for head_p, nclass in zip(params["heads"], NUM_CLASSES):
        wl, bl = head_p["in_linear_w"], head_p["in_linear_b"]    # (ninp,F), (ninp,)
        ipw, ipb = head_p["in_proj_w"], head_p["in_proj_b"]      # (3ninp,ninp), (3ninp,)
        wo, bo = head_p["out_proj_w"], head_p["out_proj_b"]      # (ninp,ninp), (ninp,)
        wc, bc = head_p["cls_w"], head_p["cls_b"]                # (nclass,ninp), (nclass,)

        def fold(w_t, b_t, s=1.0):
            # (feats @ Wl.T + bl) @ w_t.T + b_t  ==  feats @ Wf + bf   (exact algebra)
            wf = (wl.T @ w_t.T) * s                              # (F, ninp)
            bf = (bl @ w_t.T + b_t) * s                          # (ninp,)
            wf_h = wf.reshape(OUT_FEAT, NHEAD, HEAD_DIM).transpose(1, 0, 2)
            bf_h = bf.reshape(NHEAD, 1, HEAD_DIM)
            return wf_h.astype(jnp.float32), bf_h.astype(jnp.float32)

        q_w, q_b = fold(ipw[:NINP],          ipb[:NINP], scale)  # MHA q-scaling folded
        k_w, k_b = fold(ipw[NINP:2 * NINP],  ipb[NINP:2 * NINP])
        v_w, v_b = fold(ipw[2 * NINP:],      ipb[2 * NINP:])

        # fold out_proj @ classifier (tile-mean commutes with both linears)
        woc_full = wo.T @ wc.T                                   # (ninp, nclass)
        boc_full = bo @ wc.T + bc                                # (nclass,)
        woc_pad = jnp.zeros((NINP, CPAD), jnp.float32).at[:, :nclass].set(woc_full)
        boc_pad = jnp.full((CPAD,), NEG_INF, jnp.float32).at[:nclass].set(boc_full)

        wq.append(q_w); bq.append(q_b); wk.append(k_w); bk.append(k_b)
        wv.append(v_w); bv.append(v_b)
        woc.append(woc_pad.reshape(NHEAD, HEAD_DIM, CPAD))
        boc.append(boc_pad.reshape(1, CPAD))

    for name, lst in (("wq", wq), ("bq", bq), ("wk", wk), ("bk", bk),
                      ("wv", wv), ("bv", bv), ("woc", woc), ("boc", boc)):
        packed[name] = jnp.stack(lst, axis=0)                    # leading classifier-head dim
    return packed


# ----------------------------- deterministic parameter init -------------------
def init_params(key):
    keys = iter(jax.random.split(key, 64))
    nrm = lambda k, shape, s=0.02: (s * jax.random.normal(k, shape)).astype(jnp.float32)

    params = {
        "backbone_w": nrm(next(keys), (OUT_FEAT, DIN)),
        "backbone_b": nrm(next(keys), (OUT_FEAT,)),
        "heads": [],
    }
    for nclass in NUM_CLASSES:
        params["heads"].append({
            "in_linear_w": nrm(next(keys), (NINP, OUT_FEAT)),
            "in_linear_b": nrm(next(keys), (NINP,)),
            "in_proj_w":   nrm(next(keys), (3 * NINP, NINP)),
            "in_proj_b":   nrm(next(keys), (3 * NINP,)),
            "out_proj_w":  nrm(next(keys), (NINP, NINP)),
            "out_proj_b":  nrm(next(keys), (NINP,)),
            "cls_w":       nrm(next(keys), (nclass, NINP)),
            "cls_b":       nrm(next(keys), (nclass,)),
        })
    return params


# ----------------------------- full Network forward ---------------------------
@jax.jit
def network_forward(x, packed):
    x_flat = x.reshape(BS * NTILES, DIN).astype(jnp.bfloat16)   # glue: flatten tiles
    out = _fused_forward(x_flat, packed)                        # (G, BS, CPAD) log-probs
    return [out[g, :, :nc] for g, nc in enumerate(NUM_CLASSES)]


if __name__ == "__main__":
    key = jax.random.PRNGKey(0)
    kx, kp = jax.random.split(key)
    x = jax.random.normal(kx, (BS, NTILES, C, H, W), dtype=jnp.float32)
    params = init_params(kp)
    packed = pack_params(params)        # one-time weight prep (outside the per-call path)

    outputs = network_forward(x, packed)
    outputs = [jax.block_until_ready(o) for o in outputs]

    # sanity: each output is log-probabilities over its class dim
    for o, nclass in zip(outputs, NUM_CLASSES):
        assert o.shape == (BS, nclass)
        row_sums = jnp.exp(o).sum(axis=1)
        assert bool(jnp.all(jnp.abs(row_sums - 1.0) < 1e-3))

    print("KERNEL_OK")
</pallas_src>

<mosaic_0001>
module attributes {stable_mosaic.version = 11 : i64} {
  func.func @_fused_network_kernel(%arg0: i32, %arg1: memref<8x768xbf16, #tpu.memory_space<vmem>>, %arg2: memref<768x128xbf16, #tpu.memory_space<vmem>>, %arg3: memref<1x128xf32, #tpu.memory_space<vmem>>, %arg4: memref<2x8xf32, #tpu.memory_space<vmem>>, %arg5: memref<8x8xf32, #tpu.memory_space<vmem>>, %arg6: memref<1x4x128x16xf32, #tpu.memory_space<vmem>>, %arg7: memref<1x4x1x16xf32, #tpu.memory_space<vmem>>, %arg8: memref<1x4x128x16xf32, #tpu.memory_space<vmem>>, %arg9: memref<1x4x1x16xf32, #tpu.memory_space<vmem>>, %arg10: memref<1x4x128x16xf32, #tpu.memory_space<vmem>>, %arg11: memref<1x4x1x16xf32, #tpu.memory_space<vmem>>, %arg12: memref<1x4x16x128xf32, #tpu.memory_space<vmem>>, %arg13: memref<1x1x128xf32, #tpu.memory_space<vmem>>, %arg14: memref<1x2x128xf32, #tpu.memory_space<vmem>>) attributes {dimension_semantics = [#tpu.dimension_semantics<parallel>], iteration_bounds = array<i64: 2>, scalar_prefetch = 0 : i64, scratch_operands = 0 : i64, tpu.core_type = #tpu.core_type<tc>, window_params = [{pipeline_mode = #tpu.pipeline_mode<synchronous>, transform_indices = @transform_0, window_bounds = array<i64: 8, 768>}, {pipeline_mode = #tpu.pipeline_mode<synchronous>, transform_indices = @transform_1, window_bounds = array<i64: 768, 128>}, {pipeline_mode = #tpu.pipeline_mode<synchronous>, transform_indices = @transform_2, window_bounds = array<i64: 1, 128>}, {pipeline_mode = #tpu.pipeline_mode<synchronous>, transform_indices = @transform_3, window_bounds = array<i64: 2, 8>}, {pipeline_mode = #tpu.pipeline_mode<synchronous>, transform_indices = @transform_4, window_bounds = array<i64: 8, 8>}, {transform_indices = @transform_5, window_bounds = array<i64: 1, 4, 128, 16>}, {transform_indices = @transform_6, window_bounds = array<i64: 1, 4, 1, 16>}, {transform_indices = @transform_7, window_bounds = array<i64: 1, 4, 128, 16>}, {transform_indices = @transform_8, window_bounds = array<i64: 1, 4, 1, 16>}, {transform_indices = @transform_9, window_bounds = array<i64: 1, 4, 128, 16>}, {transform_indices = @transform_10, window_bounds = array<i64: 1, 4, 1, 16>}, {transform_indices = @transform_11, window_bounds = array<i64: 1, 4, 16, 128>}, {transform_indices = @transform_12, window_bounds = array<i64: 1, 1, 128>}, {transform_indices = @transform_13, window_bounds = array<i64: 1, 2, 128>}]} {
    %c0 = arith.constant 0 : index
    %c0_0 = arith.constant 0 : index
    %0 = vector.load %arg1[%c0, %c0_0] : memref<8x768xbf16, #tpu.memory_space<vmem>>, vector<8x768xbf16>
    %c0_1 = arith.constant 0 : index
    %c0_2 = arith.constant 0 : index
    %1 = vector.load %arg2[%c0_1, %c0_2] : memref<768x128xbf16, #tpu.memory_space<vmem>>, vector<768x128xbf16>
    %cst = arith.constant dense<0.000000e+00> : vector<8x128xf32>
    %2 = tpu.matmul %0, %1, %cst {dimension_numbers = #tpu.dot_dimension_numbers<[1], [0], [0], [1], [0, 0, 1, 1], [], []>} : vector<8x768xbf16>, vector<768x128xbf16>, vector<8x128xf32> -> vector<8x128xf32>
    %c0_3 = arith.constant 0 : index
    %c0_4 = arith.constant 0 : index
    %3 = vector.load %arg3[%c0_3, %c0_4] : memref<1x128xf32, #tpu.memory_space<vmem>>, vector<1x128xf32>
    %4 = vector.broadcast %3 : vector<1x128xf32> to vector<8x128xf32>
    %5 = arith.addf %2, %4 : vector<8x128xf32>
    %6 = vector.shape_cast %5 : vector<8x128xf32> to vector<1x8x128xf32>
    %7 = vector.shape_cast %6 : vector<1x8x128xf32> to vector<1x8x128xf32>
    %8 = vector.broadcast %7 : vector<1x8x128xf32> to vector<4x8x128xf32>
    %c0_5 = arith.constant 0 : index
    %c0_6 = arith.constant 0 : index
    %c0_7 = arith.constant 0 : index
    %c0_8 = arith.constant 0 : index
    %9 = vector.load %arg6[%c0_5, %c0_6, %c0_7, %c0_8] : memref<1x4x128x16xf32, #tpu.memory_space<vmem>>, vector<1x4x128x16xf32>
    %10 = vector.shape_cast %9 : vector<1x4x128x16xf32> to vector<4x128x16xf32>
    %cst_9 = arith.constant dense<0.000000e+00> : vector<4x8x16xf32>
    %11 = tpu.matmul %8, %10, %cst_9 {dimension_numbers = #tpu.dot_dimension_numbers<[2], [1], [1], [2], [0, 0, 0, 1, 1, 2], [0], [0]>} : vector<4x8x128xf32>, vector<4x128x16xf32>, vector<4x8x16xf32> -> vector<4x8x16xf32>
    %c0_10 = arith.constant 0 : index
    %c0_11 = arith.constant 0 : index
    %c0_12 = arith.constant 0 : index
    %c0_13 = arith.constant 0 : index
    %12 = vector.load %arg7[%c0_10, %c0_11, %c0_12, %c0_13] : memref<1x4x1x16xf32, #tpu.memory_space<vmem>>, vector<1x4x1x16xf32>
    %13 = vector.shape_cast %12 : vector<1x4x1x16xf32> to vector<4x1x16xf32>
    %14 = vector.broadcast %13 : vector<4x1x16xf32> to vector<4x8x16xf32>
    %15 = arith.addf %11, %14 : vector<4x8x16xf32>
    %c0_14 = arith.constant 0 : index
    %c0_15 = arith.constant 0 : index
    %c0_16 = arith.constant 0 : index
    %c0_17 = arith.constant 0 : index
    %16 = vector.load %arg8[%c0_14, %c0_15, %c0_16, %c0_17] : memref<1x4x128x16xf32, #tpu.memory_space<vmem>>, vector<1x4x128x16xf32>
    %17 = vector.shape_cast %16 : vector<1x4x128x16xf32> to vector<4x128x16xf32>
    %cst_18 = arith.constant dense<0.000000e+00> : vector<4x8x16xf32>
    %18 = tpu.matmul %8, %17, %cst_18 {dimension_numbers = #tpu.dot_dimension_numbers<[2], [1], [1], [2], [0, 0, 0, 1, 1, 2], [0], [0]>} : vector<4x8x128xf32>, vector<4x128x16xf32>, vector<4x8x16xf32> -> vector<4x8x16xf32>
    %c0_19 = arith.constant 0 : index
    %c0_20 = arith.constant 0 : index
    %c0_21 = arith.constant 0 : index
    %c0_22 = arith.constant 0 : index
    %19 = vector.load %arg9[%c0_19, %c0_20, %c0_21, %c0_22] : memref<1x4x1x16xf32, #tpu.memory_space<vmem>>, vector<1x4x1x16xf32>
    %20 = vector.shape_cast %19 : vector<1x4x1x16xf32> to vector<4x1x16xf32>
    %21 = vector.broadcast %20 : vector<4x1x16xf32> to vector<4x8x16xf32>
    %22 = arith.addf %18, %21 : vector<4x8x16xf32>
    %c0_23 = arith.constant 0 : index
    %c0_24 = arith.constant 0 : index
    %c0_25 = arith.constant 0 : index
    %c0_26 = arith.constant 0 : index
    %23 = vector.load %arg10[%c0_23, %c0_24, %c0_25, %c0_26] : memref<1x4x128x16xf32, #tpu.memory_space<vmem>>, vector<1x4x128x16xf32>
    %24 = vector.shape_cast %23 : vector<1x4x128x16xf32> to vector<4x128x16xf32>
    %cst_27 = arith.constant dense<0.000000e+00> : vector<4x8x16xf32>
    %25 = tpu.matmul %8, %24, %cst_27 {dimension_numbers = #tpu.dot_dimension_numbers<[2], [1], [1], [2], [0, 0, 0, 1, 1, 2], [0], [0]>} : vector<4x8x128xf32>, vector<4x128x16xf32>, vector<4x8x16xf32> -> vector<4x8x16xf32>
    %c0_28 = arith.constant 0 : index
    %c0_29 = arith.constant 0 : index
    %c0_30 = arith.constant 0 : index
    %c0_31 = arith.constant 0 : index
    %26 = vector.load %arg11[%c0_28, %c0_29, %c0_30, %c0_31] : memref<1x4x1x16xf32, #tpu.memory_space<vmem>>, vector<1x4x1x16xf32>
    %27 = vector.shape_cast %26 : vector<1x4x1x16xf32> to vector<4x1x16xf32>
    %28 = vector.broadcast %27 : vector<4x1x16xf32> to vector<4x8x16xf32>
    %29 = arith.addf %25, %28 : vector<4x8x16xf32>
    %cst_32 = arith.constant dense<0.000000e+00> : vector<4x8x8xf32>
    %30 = tpu.matmul %15, %22, %cst_32 {dimension_numbers = #tpu.dot_dimension_numbers<[2], [2], [1], [1], [0, 0, 0, 1, 1, 1], [0], [0]>} : vector<4x8x16xf32>, vector<4x8x16xf32>, vector<4x8x8xf32> -> vector<4x8x8xf32>
    %c0_33 = arith.constant 0 : index
    %c0_34 = arith.constant 0 : index
    %31 = vector.load %arg5[%c0_33, %c0_34] : memref<8x8xf32, #tpu.memory_space<vmem>>, vector<8x8xf32>
    %32 = vector.shape_cast %31 : vector<8x8xf32> to vector<1x8x8xf32>
    %33 = vector.broadcast %32 : vector<1x8x8xf32> to vector<4x8x8xf32>
    %34 = arith.addf %30, %33 : vector<4x8x8xf32>
    %cst_35 = arith.constant dense<0xFF800000> : vector<4x8xf32>
    %35 = vector.multi_reduction <maximumf>, %34, %cst_35 [2] : vector<4x8x8xf32> to vector<4x8xf32>
    %36 = vector.shape_cast %35 : vector<4x8xf32> to vector<4x8x1xf32>
    %37 = vector.broadcast %36 : vector<4x8x1xf32> to vector<4x8x8xf32>
    %38 = arith.subf %34, %37 : vector<4x8x8xf32>
    %39 = math.exp %38 : vector<4x8x8xf32>
    %cst_36 = arith.constant dense<0.000000e+00> : vector<4x8xf32>
    %40 = vector.multi_reduction <add>, %39, %cst_36 [2] : vector<4x8x8xf32> to vector<4x8xf32>
    %41 = vector.shape_cast %40 : vector<4x8xf32> to vector<4x8x1xf32>
    %42 = tpu.reciprocal %41 {approx = true} : vector<4x8x1xf32> -> vector<4x8x1xf32>
    %43 = vector.broadcast %42 : vector<4x8x1xf32> to vector<4x8x8xf32>
    %44 = arith.mulf %39, %43 : vector<4x8x8xf32>
    %cst_37 = arith.constant dense<0.000000e+00> : vector<4x8x16xf32>
    %45 = tpu.matmul %44, %29, %cst_37 {dimension_numbers = #tpu.dot_dimension_numbers<[2], [1], [1], [2], [0, 0, 0, 1, 1, 2], [0], [0]>} : vector<4x8x8xf32>, vector<4x8x16xf32>, vector<4x8x16xf32> -> vector<4x8x16xf32>
    %c0_38 = arith.constant 0 : index
    %c0_39 = arith.constant 0 : index
    %c0_40 = arith.constant 0 : index
    %c0_41 = arith.constant 0 : index
    %46 = vector.load %arg12[%c0_38, %c0_39, %c0_40, %c0_41] : memref<1x4x16x128xf32, #tpu.memory_space<vmem>>, vector<1x4x16x128xf32>
    %47 = vector.shape_cast %46 : vector<1x4x16x128xf32> to vector<4x16x128xf32>
    %cst_42 = arith.constant dense<0.000000e+00> : vector<4x8x128xf32>
    %48 = tpu.matmul %45, %47, %cst_42 {dimension_numbers = #tpu.dot_dimension_numbers<[2], [1], [1], [2], [0, 0, 0, 1, 1, 2], [0], [0]>} : vector<4x8x16xf32>, vector<4x16x128xf32>, vector<4x8x128xf32> -> vector<4x8x128xf32>
    %cst_43 = arith.constant dense<0.000000e+00> : vector<8x128xf32>
    %49 = vector.multi_reduction <add>, %48, %cst_43 [0] : vector<4x8x128xf32> to vector<8x128xf32>
    %c0_44 = arith.constant 0 : index
    %c0_45 = arith.constant 0 : index
    %50 = vector.load %arg4[%c0_44, %c0_45] : memref<2x8xf32, #tpu.memory_space<vmem>>, vector<2x8xf32>
    %cst_46 = arith.constant dense<0.000000e+00> : vector<2x128xf32>
    %51 = tpu.matmul %50, %49, %cst_46 {dimension_numbers = #tpu.dot_dimension_numbers<[1], [0], [0], [1], [0, 0, 1, 1], [], []>} : vector<2x8xf32>, vector<8x128xf32>, vector<2x128xf32> -> vector<2x128xf32>
    %c0_47 = arith.constant 0 : index
    %c0_48 = arith.constant 0 : index
    %c0_49 = arith.constant 0 : index
    %52 = vector.load %arg13[%c0_47, %c0_48, %c0_49] : memref<1x1x128xf32, #tpu.memory_space<vmem>>, vector<1x1x128xf32>
    %53 = vector.shape_cast %52 : vector<1x1x128xf32> to vector<1x128xf32>
    %54 = vector.broadcast %53 : vector<1x128xf32> to vector<2x128xf32>
    %55 = arith.addf %51, %54 : vector<2x128xf32>
    %cst_50 = arith.constant dense<0xFF800000> : vector<2xf32>
    %56 = vector.multi_reduction <maximumf>, %55, %cst_50 [1] : vector<2x128xf32> to vector<2xf32>
    %57 = vector.shape_cast %56 : vector<2xf32> to vector<2x1xf32>
    %58 = vector.broadcast %57 : vector<2x1xf32> to vector<2x128xf32>
    %59 = arith.subf %55, %58 : vector<2x128xf32>
    %60 = math.exp %59 : vector<2x128xf32>
    %cst_51 = arith.constant dense<0.000000e+00> : vector<2xf32>
    %61 = vector.multi_reduction <add>, %60, %cst_51 [1] : vector<2x128xf32> to vector<2xf32>
    %62 = vector.shape_cast %61 : vector<2xf32> to vector<2x1xf32>
    %63 = math.log %62 : vector<2x1xf32>
    %64 = vector.broadcast %63 : vector<2x1xf32> to vector<2x128xf32>
    %65 = arith.subf %59, %64 : vector<2x128xf32>
    %c0_52 = arith.constant 0 : index
    %c0_53 = arith.constant 0 : index
    %c0_54 = arith.constant 0 : index
    %66 = vector.load %arg14[%c0_52, %c0_53, %c0_54] : memref<1x2x128xf32, #tpu.memory_space<vmem>>, vector<1x2x128xf32>
    %67 = vector.shape_cast %66 : vector<1x2x128xf32> to vector<2x128xf32>
    %68 = vector.shape_cast %65 : vector<2x128xf32> to vector<1x2x128xf32>
    tpu.vector_store %arg14[%c0_52, %c0_53, %c0_54], %68 {strides = array<i32>} : memref<1x2x128xf32, #tpu.memory_space<vmem>>, vector<1x2x128xf32>,
    return
  }
  func.func @transform_0(%arg0: i32) -> (i32, i32) {
    %c0_i32 = arith.constant 0 : i32
    %c0_i32_0 = arith.constant 0 : i32
    %c0_i32_1 = arith.constant 0 : i32
    return %c0_i32, %c0_i32_0 : i32, i32
  }
  func.func @transform_1(%arg0: i32) -> (i32, i32) {
    %c0_i32 = arith.constant 0 : i32
    %c0_i32_0 = arith.constant 0 : i32
    %c0_i32_1 = arith.constant 0 : i32
    return %c0_i32, %c0_i32_0 : i32, i32
  }
  func.func @transform_2(%arg0: i32) -> (i32, i32) {
    %c0_i32 = arith.constant 0 : i32
    %c0_i32_0 = arith.constant 0 : i32
    %c0_i32_1 = arith.constant 0 : i32
    return %c0_i32, %c0_i32_0 : i32, i32
  }
  func.func @transform_3(%arg0: i32) -> (i32, i32) {
    %c0_i32 = arith.constant 0 : i32
    %c0_i32_0 = arith.constant 0 : i32
    %c0_i32_1 = arith.constant 0 : i32
    return %c0_i32, %c0_i32_0 : i32, i32
  }
  func.func @transform_4(%arg0: i32) -> (i32, i32) {
    %c0_i32 = arith.constant 0 : i32
    %c0_i32_0 = arith.constant 0 : i32
    %c0_i32_1 = arith.constant 0 : i32
    return %c0_i32, %c0_i32_0 : i32, i32
  }
  func.func @transform_5(%arg0: i32) -> (i32, i32, i32, i32) {
    %c0_i32 = arith.constant 0 : i32
    %c0_i32_0 = arith.constant 0 : i32
    %c0_i32_1 = arith.constant 0 : i32
    %c0_i32_2 = arith.constant 0 : i32
    return %arg0, %c0_i32, %c0_i32_0, %c0_i32_1 : i32, i32, i32, i32
  }
  func.func @transform_6(%arg0: i32) -> (i32, i32, i32, i32) {
    %c0_i32 = arith.constant 0 : i32
    %c0_i32_0 = arith.constant 0 : i32
    %c0_i32_1 = arith.constant 0 : i32
    %c0_i32_2 = arith.constant 0 : i32
    return %arg0, %c0_i32, %c0_i32_0, %c0_i32_1 : i32, i32, i32, i32
  }
  func.func @transform_7(%arg0: i32) -> (i32, i32, i32, i32) {
    %c0_i32 = arith.constant 0 : i32
    %c0_i32_0 = arith.constant 0 : i32
    %c0_i32_1 = arith.constant 0 : i32
    %c0_i32_2 = arith.constant 0 : i32
    return %arg0, %c0_i32, %c0_i32_0, %c0_i32_1 : i32, i32, i32, i32
  }
  func.func @transform_8(%arg0: i32) -> (i32, i32, i32, i32) {
    %c0_i32 = arith.constant 0 : i32
    %c0_i32_0 = arith.constant 0 : i32
    %c0_i32_1 = arith.constant 0 : i32
    %c0_i32_2 = arith.constant 0 : i32
    return %arg0, %c0_i32, %c0_i32_0, %c0_i32_1 : i32, i32, i32, i32
  }
  func.func @transform_9(%arg0: i32) -> (i32, i32, i32, i32) {
    %c0_i32 = arith.constant 0 : i32
    %c0_i32_0 = arith.constant 0 : i32
    %c0_i32_1 = arith.constant 0 : i32
    %c0_i32_2 = arith.constant 0 : i32
    return %arg0, %c0_i32, %c0_i32_0, %c0_i32_1 : i32, i32, i32, i32
  }
  func.func @transform_10(%arg0: i32) -> (i32, i32, i32, i32) {
    %c0_i32 = arith.constant 0 : i32
    %c0_i32_0 = arith.constant 0 : i32
    %c0_i32_1 = arith.constant 0 : i32
    %c0_i32_2 = arith.constant 0 : i32
    return %arg0, %c0_i32, %c0_i32_0, %c0_i32_1 : i32, i32, i32, i32
  }
  func.func @transform_11(%arg0: i32) -> (i32, i32, i32, i32) {
    %c0_i32 = arith.constant 0 : i32
    %c0_i32_0 = arith.constant 0 : i32
    %c0_i32_1 = arith.constant 0 : i32
    %c0_i32_2 = arith.constant 0 : i32
    return %arg0, %c0_i32, %c0_i32_0, %c0_i32_1 : i32, i32, i32, i32
  }
  func.func @transform_12(%arg0: i32) -> (i32, i32, i32) {
    %c0_i32 = arith.constant 0 : i32
    %c0_i32_0 = arith.constant 0 : i32
    %c0_i32_1 = arith.constant 0 : i32
    return %arg0, %c0_i32, %c0_i32_0 : i32, i32, i32
  }
  func.func @transform_13(%arg0: i32) -> (i32, i32, i32) {
    %c0_i32 = arith.constant 0 : i32
    %c0_i32_0 = arith.constant 0 : i32
    %c0_i32_1 = arith.constant 0 : i32
    return %arg0, %c0_i32, %c0_i32_0 : i32, i32, i32
  }
}

</mosaic_0001>

<bundles_post_ra>
// kernel: network_forward.1
= control target key start
LH: loop header
LB: loop body
LE: loop exit
PB: predicated region body
PF: predicated region fallthrough
CT: control target
= control target key end

     0   :  { %s4763_s25 = smov 0   ;;  %s5405_s0 = inlined_call_operand.vmem [shape: bf16[8,768], index: 0, kind: input, shape index: {}]   ;;  %s5406_s1 = inlined_call_operand.vmem [shape: bf16[768,128], index: 1, kind: input, shape index: {}]   ;;  %s5407_s2 = inlined_call_operand.vmem [shape: f32[1,128], index: 2, kind: input, shape index: {}]   ;;  %s5408_s3 = inlined_call_operand.vmem [shape: f32[2,8], index: 3, kind: input, shape index: {}]   ;;  %s5409_s4 = inlined_call_operand.vmem [shape: f32[8,8], index: 4, kind: input, shape index: {}]   ;;  %s5410_s5 = inlined_call_operand.vmem [shape: f32[2,4,128,16], index: 5, kind: input, shape index: {}]   ;;  %s5411_s6 = inlined_call_operand.vmem [shape: f32[2,4,1,16], index: 6, kind: input, shape index: {}]   ;;  %s5412_s7 = inlined_call_operand.vmem [shape: f32[2,4,128,16], index: 7, kind: input, shape index: {}]   ;;  %s5413_s8 = inlined_call_operand.vmem [shape: f32[2,4,1,16], index: 8, kind: input, shape index: {}]   ;;  %s5414_s9 = inlined_call_operand.vmem [shape: f32[2,4,128,16], index: 9, kind: input, shape index: {}]   ;;  %s5415_s10 = inlined_call_operand.vmem [shape: f32[2,4,1,16], index: 10, kind: input, shape index: {}]   ;;  %s5416_s11 = inlined_call_operand.vmem [shape: f32[2,4,16,128], index: 11, kind: input, shape index: {}]   ;;  %s5417_s12 = inlined_call_operand.vmem [shape: f32[2,1,128], index: 12, kind: input, shape index: {}]   ;;  %s5418_s13 = inlined_call_operand.vmem [shape: f32[2,2,128], index: 13, kind: output, shape index: {}]  }
   0x1 LB: > { %s3391_s26 = sadd.s32 4294967295, %s4688_s25   ;;  %p3395_p0 = scmp.ge.s32.totalorder %s4688_s25, 1  ;;  %s4688_s25 = sphi %s4763_s25, %s23_s25  }
   0x2   : > { %p452_p1 = scmp.lt.s32.totalorder %s4688_s25, 3 }
   0x4   : > { %p453_p2 = pnand %p3395_p0, %p452_p1 }
   0x5   : > { %v4608_v0 = vld [vmem:[%s5406_s1 + $0x40] sm:$0xff] (!%p453_p2)   ;;  %v4612_v4 = vld [vmem:[%s5406_s1 + $0x48] sm:$0xff] (!%p453_p2)   ;;  %v4616_v8 = vld [vmem:[%s5406_s1 + $0x50] sm:$0xff] (!%p453_p2)   ;;  %p525_p3 = scmp.lt.s32.totalorder (!%p453_p2), %s3391_s26, 1  ;;  %v4690_v62 = vmov (!%p453_p2), 0.0|0.0   ;;  %vm4691_vm0 = vmmov (!%p453_p2), 0  }
   0x6   : > { %456 = sbr.rel (%p453_p2) target bundleno = 2094 (0x82e), region = 72  ;;  %v4609_v1 = vld [vmem:[%s5406_s1] sm:$0xff] (!%p453_p2)   ;;  %3499 = vmatprep.subr.bf16.mxu0 (!%p453_p2), %v4608_v0  ;;  %v4613_v5 = vld [vmem:[%s5406_s1 + $0x8] sm:$0xff] (!%p453_p2)   ;;  %v4617_v9 = vld [vmem:[%s5406_s1 + $0x10] sm:$0xff] (!%p453_p2)   ;;  %vm2217_vm1 = vcmask (!%p453_p2), 130048   ;;  %vm2522_vm2 = vcmask (!%p453_p2), 64512  }
   0x7   : > { %v4610_v2 = vld [vmem:[%s5406_s1 + $0xc0] sm:$0xff] (!%p453_p2)   ;;  %3500 = vmatpush3.bf16.msra.mxu0 (!%p453_p2), %v4609_v1  ;;  %v4614_v6 = vld [vmem:[%s5406_s1 + $0xc8] sm:$0xff] (!%p453_p2)   ;;  %v4618_v10 = vld [vmem:[%s5406_s1 + $0xd0] sm:$0xff] (!%p453_p2)   ;;  %vm3243_vm3 = vcmask (!%p453_p2), 1041408  }
   0x8   : > { %v4611_v3 = vld [vmem:[%s5406_s1 + $0x80] sm:$0xff] (!%p453_p2)   ;;  %3521 = vmatprep.subr.bf16.mxu1 (!%p453_p2), %v4610_v2  ;;  %3501 = vmatprep.subr.bf16.mxu0 (!%p453_p2), %v4612_v4  ;;  %v4615_v7 = vld [vmem:[%s5406_s1 + $0x88] sm:$0xff] (!%p453_p2)   ;;  %v4619_v11 = vld [vmem:[%s5406_s1 + $0x90] sm:$0xff] (!%p453_p2)  }
   0x9   : > { %3522 = vmatpush3.bf16.msra.mxu1 (!%p453_p2), %v4611_v3  ;;  %v4620_v12 = vld [vmem:[%s5406_s1 + $0x58] sm:$0xff] (!%p453_p2)   ;;  %v4624_v16 = vld [vmem:[%s5406_s1 + $0x60] sm:$0xff] (!%p453_p2)   ;;  %v4628_v20 = vld [vmem:[%s5406_s1 + $0x68] sm:$0xff] (!%p453_p2)  }
   0xa   : > { %3523 = vmatprep.subr.bf16.mxu1 (!%p453_p2), %v4614_v6  ;;  %v4621_v13 = vld [vmem:[%s5406_s1 + $0x18] sm:$0xff] (!%p453_p2)   ;;  %v4625_v17 = vld [vmem:[%s5406_s1 + $0x20] sm:$0xff] (!%p453_p2)   ;;  %v4629_v21 = vld [vmem:[%s5406_s1 + $0x28] sm:$0xff] (!%p453_p2)  }
   0xb   : > { %3502 = vmatpush3.bf16.msra.mxu0 (!%p453_p2), %v4613_v5  ;;  %v4622_v14 = vld [vmem:[%s5406_s1 + $0xd8] sm:$0xff] (!%p453_p2)   ;;  %v4626_v18 = vld [vmem:[%s5406_s1 + $0xe0] sm:$0xff] (!%p453_p2)   ;;  %v4630_v22 = vld [vmem:[%s5406_s1 + $0xe8] sm:$0xff] (!%p453_p2)  }
   0xc   : > { %3503 = vmatprep.subr.bf16.mxu0 (!%p453_p2), %v4616_v8  ;;  %v4623_v15 = vld [vmem:[%s5406_s1 + $0x98] sm:$0xff] (!%p453_p2)   ;;  %v4627_v19 = vld [vmem:[%s5406_s1 + $0xa0] sm:$0xff] (!%p453_p2)   ;;  %v4631_v23 = vld [vmem:[%s5406_s1 + $0xa8] sm:$0xff] (!%p453_p2)  }
   0xd   : > { %3524 = vmatpush3.bf16.msra.mxu1 %v4615_v7  ;;  %v4632_v24 = vld [vmem:[%s5406_s1 + $0x70] sm:$0xff]   ;;  %v4636_v28 = vld [vmem:[%s5406_s1 + $0x78] sm:$0xff]   ;;  %v565_v31 = vld [vmem:[%s5405_s0] sm:$0xff]  ;;  %s5420_s26 = smov (!%p525_p3, %s3391_s26), 1 }
   0xe   : > { %3525 = vmatprep.subr.bf16.mxu1 %v4618_v10  ;;  %v4633_v25 = vld [vmem:[%s5406_s1 + $0x30] sm:$0xff]   ;;  %v4637_v29 = vld [vmem:[%s5406_s1 + $0x38] sm:$0xff]   ;;  %v3409_v32 = vcombine.low %v565_v31, %v565_v31  ;;  %v3410_v33 = vcombine.high %v565_v31, %v565_v31  ;;  %v4642_v35 = vld [vmem:[%s5406_s1 + $0x140] sm:$0xff]   ;;  %s4931_s22 = sshll.u32 %s5420_s26, 9  ;;  %s5287_s19 = sshll.u32 %s5420_s26, 2 }
   0xf   : > { %3504 = vmatpush3.bf16.msra.mxu0 %v4617_v9  ;;  %v4634_v26 = vld [vmem:[%s5406_s1 + $0xf0] sm:$0xff]   ;;  %v4638_v30 = vld [vmem:[%s5406_s1 + $0xf8] sm:$0xff]   ;;  %v566_v36 = vld [vmem:[%s5405_s0 + $0x8] sm:$0xff]  ;;  %s4937_s27 = scalar_lea.vmem %s5410_s5, %s4931_s22  ;;  %s5052_s15 = scalar_lea.vmem %s5412_s7, %s4931_s22 }
  0x10   : > { %3505 = vmatprep.subr.bf16.mxu0 %v4620_v12  ;;  %v4635_v27 = vld [vmem:[%s5406_s1 + $0xb0] sm:$0xff]   ;;  %v4641_v34 = vld [vmem:[%s5406_s1 + $0xb8] sm:$0xff]   ;;  %1012 = vmatprep.mubr.bf16.mxu0 %v3410_v33  ;;  %v3411_v37 = vcombine.low %v566_v36, %v566_v36  ;;  %v3412_v38 = vcombine.high %v566_v36, %v566_v36  ;;  %v4645_v39 = vld [vmem:[%s5406_s1 + $0x100] sm:$0xff]   ;;  %s5166_s18 = scalar_lea.vmem %s5414_s9, %s4931_s22  ;;  %s542_s22 = scalar_lea.vmem %s5413_s8, %s5287_s19 }
  0x11   : > { %3526 = vmatpush3.bf16.msra.mxu1 %v4619_v11  ;;  %v4646_v40 = vld [vmem:[%s5406_s1 + $0x148] sm:$0xff]   ;;  %v4648_v42 = vld [vmem:[%s5406_s1 + $0x150] sm:$0xff]   ;;  %v4650_v44 = vld [vmem:[%s5406_s1 + $0x158] sm:$0xff]   ;;  %s551_s30 = scalar_lea.vmem %s5415_s10, %s5287_s19  ;;  %s3498_s16 = sshll.u32 %s5420_s26, 6 }
  0x12   : > { %3527 = vmatprep.subr.bf16.mxu1 %v4622_v14  ;;  %1052 = vmatprep.mubr.bf16.mxu1 %v3412_v38  ;;  %v4647_v41 = vld [vmem:[%s5406_s1 + $0x108] sm:$0xff]   ;;  %v4649_v43 = vld [vmem:[%s5406_s1 + $0x110] sm:$0xff]   ;;  %v4651_v45 = vld [vmem:[%s5406_s1 + $0x118] sm:$0xff]   ;;  %s559_s24 = scalar_lea.vmem %s5417_s12, %s5420_s26 }
  0x13   : > { %3506 = vmatpush3.bf16.msra.mxu0 %v4621_v13  ;;  %v4652_v46 = vld [vmem:[%s5406_s1 + $0x160] sm:$0xff]   ;;  %v567_v48 = vld [vmem:[%s5405_s0 + $0x10] sm:$0xff]  ;;  %v4654_v49 = vld [vmem:[%s5406_s1 + $0x168] sm:$0xff]  }
  0x14   : > { %3507 = vmatprep.subr.bf16.mxu0 %v4624_v16  ;;  %v4653_v47 = vld [vmem:[%s5406_s1 + $0x120] sm:$0xff]   ;;  %v3414_v50 = vcombine.high %v567_v48, %v567_v48  ;;  %v4655_v51 = vld [vmem:[%s5406_s1 + $0x128] sm:$0xff]   ;;  %v4656_v52 = vld [vmem:[%s5406_s1 + $0x170] sm:$0xff]   ;;  %v3413_v56 = vcombine.low %v567_v48, %v567_v48 }
  0x15   : > { %3528 = vmatpush3.bf16.msra.mxu1 %v4623_v15  ;;  %v4657_v53 = vld [vmem:[%s5406_s1 + $0x130] sm:$0xff]   ;;  %v4658_v54 = vld [vmem:[%s5406_s1 + $0x178] sm:$0xff]   ;;  %v1100_v57 = vld [vmem:[%s4937_s27] sm:$0xff] }
  0x16   : > { %3529 = vmatprep.subr.bf16.mxu1 %v4626_v18  ;;  %v4659_v55 = vld [vmem:[%s5406_s1 + $0x138] sm:$0xff]   ;;  %v1101_v58 = vld [vmem:[%s4937_s27 + $0x8] sm:$0xff]  ;;  %v1116_v59 = vld [vmem:[%s4937_s27 + $0x80] sm:$0xff] }
  0x17   : > { %3508 = vmatpush3.bf16.msra.mxu0 %v4625_v17  ;;  %v4293_v60 = vpack.c.bf16 %v1101_v58, %v1100_v57  ;;  %v1117_v61 = vld [vmem:[%s4937_s27 + $0x88] sm:$0xff]  ;;  %v1102_v0 = vld [vmem:[%s4937_s27 + $0x10] sm:$0xff]  ;;  %v1103_v1 = vld [vmem:[%s4937_s27 + $0x18] sm:$0xff] }
  0x18   : > { %3509 = vmatprep.subr.bf16.mxu0 %v4628_v20  ;;  %v4317_v63 = vpack.c.bf16 %v1117_v61, %v1116_v59  ;;  %v1118_v2 = vld [vmem:[%s4937_s27 + $0x90] sm:$0xff]  ;;  %v4296_v3 = vpack.c.bf16 %v1103_v1, %v1102_v0  ;;  %v1119_v4 = vld [vmem:[%s4937_s27 + $0x98] sm:$0xff]  ;;  %v1104_v5 = vld [vmem:[%s4937_s27 + $0x20] sm:$0xff] }
  0x19   : > { %3530 = vmatpush3.bf16.msra.mxu1 %v4627_v19  ;;  %v1105_v6 = vld [vmem:[%s4937_s27 + $0x28] sm:$0xff]  ;;  %v4320_v7 = vpack.c.bf16 %v1119_v4, %v1118_v2  ;;  %v1120_v8 = vld [vmem:[%s4937_s27 + $0xa0] sm:$0xff]  ;;  %v1106_v12 = vld [vmem:[%s4937_s27 + $0x30] sm:$0xff] }
  0x1a   : > { %3531 = vmatprep.subr.bf16.mxu1 %v4630_v22  ;;  %v1121_v9 = vld [vmem:[%s4937_s27 + $0xa8] sm:$0xff]  ;;  %v4299_v10 = vpack.c.bf16 %v1105_v6, %v1104_v5  ;;  %v1107_v13 = vld [vmem:[%s4937_s27 + $0x38] sm:$0xff]  ;;  %v1122_v14 = vld [vmem:[%s4937_s27 + $0xb0] sm:$0xff] }
  0x1b   : > { %3510 = vmatpush3.bf16.msra.mxu0 %v4629_v21  ;;  %v4323_v11 = vpack.c.bf16 %v1121_v9, %v1120_v8  ;;  %v1123_v15 = vld [vmem:[%s4937_s27 + $0xb8] sm:$0xff]  ;;  %v4302_v16 = vpack.c.bf16 %v1107_v13, %v1106_v12  ;;  %v1108_v18 = vld [vmem:[%s4937_s27 + $0x40] sm:$0xff]  ;;  %v1109_v19 = vld [vmem:[%s4937_s27 + $0x48] sm:$0xff] }
  0x1c   : > { %3511 = vmatprep.subr.bf16.mxu0 %v4632_v24  ;;  %v4326_v17 = vpack.c.bf16 %v1123_v15, %v1122_v14  ;;  %v1124_v20 = vld [vmem:[%s4937_s27 + $0xc0] sm:$0xff]  ;;  %v1125_v21 = vld [vmem:[%s4937_s27 + $0xc8] sm:$0xff]  ;;  %v4305_v22 = vpack.c.bf16 %v1109_v19, %v1108_v18  ;;  %v1110_v24 = vld [vmem:[%s4937_s27 + $0x50] sm:$0xff] }
  0x1d   : > { %3532 = vmatpush3.bf16.msra.mxu1 %v4631_v23  ;;  %v4329_v23 = vpack.c.bf16 %v1125_v21, %v1124_v20  ;;  %v1113_v31 = vld [vmem:[%s4937_s27 + $0x68] sm:$0xff]  ;;  %v1114_v36 = vld [vmem:[%s4937_s27 + $0x70] sm:$0xff]  ;;  %v1148_v59 = vld [vmem:[%s4937_s27 + $0x180] sm:$0xff] }
  0x1e   : > { %3533 = vmatprep.subr.bf16.mxu1 %v4634_v26  ;;  %v1126_v26 = vld [vmem:[%s4937_s27 + $0xd0] sm:$0xff]  ;;  %v1129_v33 = vld [vmem:[%s4937_s27 + $0xe8] sm:$0xff]  ;;  %v1135_v6 = vld [vmem:[%s4937_s27 + $0x118] sm:$0xff] }
  0x1f   : > { %3512 = vmatpush3.bf16.msra.mxu0 %v4633_v25  ;;  %v1111_v25 = vld [vmem:[%s4937_s27 + $0x58] sm:$0xff]  ;;  %v1130_v38 = vld [vmem:[%s4937_s27 + $0xf0] sm:$0xff]  ;;  %v1133_v58 = vld [vmem:[%s4937_s27 + $0x108] sm:$0xff] }
  0x20   : > { %3513 = vmatprep.subr.bf16.mxu0 %v4636_v28  ;;  %v4308_v28 = vpack.c.bf16 %v1111_v25, %v1110_v24  ;;  %v1134_v4 = vld [vmem:[%s4937_s27 + $0x110] sm:$0xff]  ;;  %v1151_v8 = vld [vmem:[%s4937_s27 + $0x198] sm:$0xff]  ;;  %v1137_v12 = vld [vmem:[%s4937_s27 + $0x128] sm:$0xff] }
  0x21   : > { %3534 = vmatpush3.bf16.msra.mxu1 %v4635_v27  ;;  %v1127_v27 = vld [vmem:[%s4937_s27 + $0xd8] sm:$0xff]  ;;  %v4344_v9 = vpack.c.bf16 %v1135_v6, %v1134_v4  ;;  %v1152_v13 = vld [vmem:[%s4937_s27 + $0x1a0] sm:$0xff]  ;;  %v1153_v14 = vld [vmem:[%s4937_s27 + $0x1a8] sm:$0xff] }
  0x22   : > { %3535 = vmatprep.subr.bf16.mxu1 %v4638_v30  ;;  %v1112_v30 = vld [vmem:[%s4937_s27 + $0x60] sm:$0xff]  ;;  %v1139_v18 = vld [vmem:[%s4937_s27 + $0x138] sm:$0xff]  ;;  %v1154_v19 = vld [vmem:[%s4937_s27 + $0x1b0] sm:$0xff] }
  0x23   : > { %3514 = vmatpush3.bf16.msra.mxu0 %v4637_v29  ;;  %v4332_v29 = vpack.c.bf16 %v1127_v27, %v1126_v26  ;;  %v1155_v20 = vld [vmem:[%s4937_s27 + $0x1b8] sm:$0xff]  ;;  %v1141_v24 = vld [vmem:[%s4937_s27 + $0x148] sm:$0xff]  ;;  %v1156_v25 = vld [vmem:[%s4937_s27 + $0x1c0] sm:$0xff] }
  0x24   : > { %3543 = vmatprep.subr.bf16.mxu0 %v4642_v35  ;;  %v1157_v26 = vld [vmem:[%s4937_s27 + $0x1c8] sm:$0xff]  ;;  %v1479_v4 = vld [vmem:[%s5052_s15 + $0x38] sm:$0xff]  ;;  %v1494_v6 = vld [vmem:[%s5052_s15 + $0xb0] sm:$0xff] }
  0x25   : > { %3536 = vmatpush3.bf16.msra.mxu1 %v4641_v34  ;;  %v4311_v34 = vpack.c.bf16 %v1113_v31, %v1112_v30  ;;  %v1143_v30 = vld [vmem:[%s4937_s27 + $0x158] sm:$0xff]  ;;  %v1158_v31 = vld [vmem:[%s4937_s27 + $0x1d0] sm:$0xff] }
  0x26   : > { %1013 = vmatmul.mubr.bf16.vlgmr.msra.gmra.mrb[0].mxu0 %v3409_v32  ;;  %4292 = vmatprep.subr.bf16.mxu1 %v4690_v62  ;;  %v1128_v32 = vld [vmem:[%s4937_s27 + $0xe0] sm:$0xff] }
  0x27   : > { %3544 = vmatpush3.bf16.msra.mxu0 %v4645_v39  ;;  %1092 = vmatprep.mubr.bf16.mxu0 %v3414_v50  ;;  %v4335_v35 = vpack.c.bf16 %v1129_v33, %v1128_v32  ;;  %v1159_v32 = vld [vmem:[%s4937_s27 + $0x1d8] sm:$0xff] }
  0x28   : > { %1053 = vmatmul.mubr.bf16.vlgmr.msra.gmra.mrb[0].mxu1 %v3411_v37  ;;  %3545 = vmatprep.subr.bf16.mxu0 %v4646_v40  ;;  %v1115_v37 = vld [vmem:[%s4937_s27 + $0x78] sm:$0xff] }
  0x29   : > { %4294 = vmatpush3.bf16.msra.mxu1 %v4293_v60  ;;  %v4314_v39 = vpack.c.bf16 %v1115_v37, %v1114_v36  ;;  %v1131_v40 = vld [vmem:[%s4937_s27 + $0xf8] sm:$0xff]  ;;  %v1149_v60 = vld [vmem:[%s4937_s27 + $0x188] sm:$0xff]  ;;  %v1160_v37 = vld [vmem:[%s4937_s27 + $0x1e0] sm:$0xff] }
  0x2a   : > { %4295 = vmatprep.subr.bf16.mxu1 %v4690_v62  ;;  %v1145_v36 = vld [vmem:[%s4937_s27 + $0x168] sm:$0xff] }
  0x2b   : > { %3546 = vmatpush3.bf16.msra.mxu0 %v4647_v41  ;;  %v4338_v41 = vpack.c.bf16 %v1131_v40, %v1130_v38  ;;  %v1161_v38 = vld [vmem:[%s4937_s27 + $0x1e8] sm:$0xff] }
  0x2c   : > { %3547 = vmatprep.subr.bf16.mxu0 %v4648_v42  ;;  %v4692_v42 = vmov 0.0   ;;  %v4383_v40 = vpack.c.bf16 %v1161_v38, %v1160_v37  ;;  %v1521_v37 = vld [vmem:[%s5052_s15 + $0x188] sm:$0xff] }
  0x2d   : > { %4297 = vmatpush3.bf16.msra.mxu1 %v4296_v3  ;;  %3831 = vmatprep.mubr.msk.f32.mxu1 %vm4691_vm0, %v4692_v42  ;;  %v4365_v3 = vpack.c.bf16 %v1149_v60, %v1148_v59  ;;  %v1476_v60 = vld [vmem:[%s5052_s15 + $0x20] sm:$0xff] }
  0x2e   : > { %4298 = vmatprep.subr.bf16.mxu1 %v4690_v62 }
  0x2f   : > { %3548 = vmatpush3.bf16.msra.mxu0 %v4649_v43 }
  0x30   : > { %3549 = vmatprep.subr.bf16.mxu0 %v4650_v44  ;;  %v3408_v44 = vld [vmem:[%s5407_s2] ss:$0 sm:$0xff] }
  0x31   : > { %4300 = vmatpush3.bf16.msra.mxu1 %v4299_v10 }
  0x32   : > { %4301 = vmatprep.subr.bf16.mxu1 %v4690_v62 }
  0x33   : > { %3550 = vmatpush3.bf16.msra.mxu0 %v4651_v45 }
  0x34   : > { %3551 = vmatprep.subr.bf16.mxu0 %v4652_v46 }
  0x35   : > { %4303 = vmatpush3.bf16.msra.mxu1 %v4302_v16  ;;  %v4371_v16 = vpack.c.bf16 %v1153_v14, %v1152_v13  ;;  %v1497_v13 = vld [vmem:[%s5052_s15 + $0xc8] sm:$0xff] }
  0x36   : > { %4304 = vmatprep.subr.bf16.mxu1 %v4690_v62 }
  0x37   : > { %3552 = vmatpush3.bf16.msra.mxu0 %v4653_v47 }
  0x38   : > { %3553 = vmatprep.subr.bf16.mxu0 %v4654_v49 }
  0x39   : > { %4306 = vmatpush3.bf16.msra.mxu1 %v4305_v22  ;;  %v4374_v22 = vpack.c.bf16 %v1155_v20, %v1154_v19  ;;  %v1499_v19 = vld [vmem:[%s5052_s15 + $0xd8] sm:$0xff] }
  0x3a   : > { %4307 = vmatprep.subr.bf16.mxu1 %v4690_v62 }
  0x3b   : > { %3554 = vmatpush3.bf16.msra.mxu0 %v4655_v51 }
  0x3c   : > { %3555 = vmatprep.subr.bf16.mxu0 %v4656_v52 }
  0x3d   : > { %4309 = vmatpush3.bf16.msra.mxu1 %v4308_v28  ;;  %v4377_v28 = vpack.c.bf16 %v1157_v26, %v1156_v25  ;;  %v1501_v25 = vld [vmem:[%s5052_s15 + $0xe8] sm:$0xff] }
  0x3e   : > { %4310 = vmatprep.subr.bf16.mxu1 %v4690_v62 }
  0x3f   : > { %3556 = vmatpush3.bf16.msra.mxu0 %v4657_v53 }
  0x40   : > { %3557 = vmatprep.subr.bf16.mxu0 %v4658_v54 }
  0x41   : > { %4312 = vmatpush3.bf16.msra.mxu1 %v4311_v34  ;;  %v4380_v34 = vpack.c.bf16 %v1159_v32, %v1158_v31  ;;  %v1503_v31 = vld [vmem:[%s5052_s15 + $0xf8] sm:$0xff] }
  0x42   : > { %4313 = vmatprep.subr.bf16.mxu1 %v4690_v62 }
  0x43   : > { %3558 = vmatpush3.bf16.msra.mxu0 %v4659_v55 }
  0x44   : > { %4316 = vmatprep.subr.bf16.mxu0 %v4690_v62 }
  0x45   : > { %4315 = vmatpush3.bf16.msra.mxu1 %v4314_v39 }
  0x46   : > { %1093 = vmatmul.mubr.bf16.vlgmr.msra.gmra.mrb[4].mxu0 %v3413_v56  ;;  %4340 = vmatprep.subr.bf16.mxu1 %v4690_v62  ;;  %v1132_v56 = vld [vmem:[%s4937_s27 + $0x100] sm:$0xff] }
  0x47   : > { %4318 = vmatpush3.bf16.msra.mxu0 %v4317_v63  ;;  %3866 = vmatprep.mubr.msk.f32.mxu0 %vm4691_vm0, %v4692_v42  ;;  %v4341_v2 = vpack.c.bf16 %v1133_v58, %v1132_v56  ;;  %v1490_v56 = vld [vmem:[%s5052_s15 + $0x90] sm:$0xff] }
  0x48   : > { %4319 = vmatprep.subr.bf16.mxu0 %v4690_v62 }
  0x4b   : > { %4321 = vmatpush3.bf16.msra.mxu0 %v4320_v7  ;;  %v1150_v7 = vld [vmem:[%s4937_s27 + $0x190] sm:$0xff] }
  0x4c   : > { %4322 = vmatprep.subr.bf16.mxu0 %v4690_v62  ;;  %v4368_v10 = vpack.c.bf16 %v1151_v8, %v1150_v7  ;;  %v1495_v7 = vld [vmem:[%s5052_s15 + $0xb8] sm:$0xff] }
  0x4f   : > { %4324 = vmatpush3.bf16.msra.mxu0 %v4323_v11  ;;  %v1136_v11 = vld [vmem:[%s4937_s27 + $0x120] sm:$0xff] }
  0x50   : > { %4325 = vmatprep.subr.bf16.mxu0 %v4690_v62  ;;  %v4347_v15 = vpack.c.bf16 %v1137_v12, %v1136_v11  ;;  %v1481_v11 = vld [vmem:[%s5052_s15 + $0x48] sm:$0xff]  ;;  %v1496_v12 = vld [vmem:[%s5052_s15 + $0xc0] sm:$0xff] }
  0x53   : > { %4327 = vmatpush3.bf16.msra.mxu0 %v4326_v17  ;;  %v1138_v17 = vld [vmem:[%s4937_s27 + $0x130] sm:$0xff] }
  0x54   : > { %4328 = vmatprep.subr.bf16.mxu0 %v4690_v62  ;;  %v4350_v21 = vpack.c.bf16 %v1139_v18, %v1138_v17  ;;  %v1483_v17 = vld [vmem:[%s5052_s15 + $0x58] sm:$0xff]  ;;  %v1498_v18 = vld [vmem:[%s5052_s15 + $0xd0] sm:$0xff] }
  0x57   : > { %4330 = vmatpush3.bf16.msra.mxu0 %v4329_v23  ;;  %v1140_v23 = vld [vmem:[%s4937_s27 + $0x140] sm:$0xff] }
  0x58   : > { %4331 = vmatprep.subr.bf16.mxu0 %v4690_v62  ;;  %v4353_v27 = vpack.c.bf16 %v1141_v24, %v1140_v23  ;;  %v1485_v23 = vld [vmem:[%s5052_s15 + $0x68] sm:$0xff]  ;;  %v1500_v24 = vld [vmem:[%s5052_s15 + $0xe0] sm:$0xff] }
  0x5b   : > { %4333 = vmatpush3.bf16.msra.mxu0 %v4332_v29  ;;  %v1142_v29 = vld [vmem:[%s4937_s27 + $0x150] sm:$0xff] }
  0x5c   : > { %4334 = vmatprep.subr.bf16.mxu0 %v4690_v62  ;;  %v4356_v33 = vpack.c.bf16 %v1143_v30, %v1142_v29  ;;  %v1487_v29 = vld [vmem:[%s5052_s15 + $0x78] sm:$0xff]  ;;  %v1502_v30 = vld [vmem:[%s5052_s15 + $0xf0] sm:$0xff] }
  0x5f   : > { %4336 = vmatpush3.bf16.msra.mxu0 %v4335_v35  ;;  %v1144_v35 = vld [vmem:[%s4937_s27 + $0x160] sm:$0xff] }
  0x60   : > { %4337 = vmatprep.subr.bf16.mxu0 %v4690_v62  ;;  %v4359_v39 = vpack.c.bf16 %v1145_v36, %v1144_v35  ;;  %v1505_v35 = vld [vmem:[%s5052_s15 + $0x108] sm:$0xff]  ;;  %v1520_v36 = vld [vmem:[%s5052_s15 + $0x180] sm:$0xff] }
  0x63   : > { %4339 = vmatpush3.bf16.msra.mxu0 %v4338_v41  ;;  %v1146_v41 = vld [vmem:[%s4937_s27 + $0x170] sm:$0xff] }
  0x64   : > { %4364 = vmatprep.subr.bf16.mxu0 %v4690_v62 }
  0xf9   : > { %v3515_v43 = vpop.f32.mrb[0].mxu0 }
  0xfa   : > { %v3516_v45 = vpop.f32.mrb[1].mxu0 }
  0xfb   : > { %v3517_v46 = vadd.f32 %v3516_v45, %v3515_v43  ;;  %v3518_v47 = vpop.f32.mrb[2].mxu0  ;;  %v3537_v48 = vpop.f32.mrb[0].mxu1  ;;  %v1147_v43 = vld [vmem:[%s4937_s27 + $0x178] sm:$0xff] }
  0xfc   : > { %v3519_v49 = vpop.f32.mrb[3].mxu0  ;;  %v3538_v50 = vpop.f32.mrb[1].mxu1  ;;  %v1163_v45 = vld [vmem:[%s4937_s27 + $0x1f8] sm:$0xff] }
  0xfd   : > { %v1015_v51 = vadd.f32 %v3517_v46, %v3408_v44  ;;  %v3539_v52 = vadd.f32 %v3538_v50, %v3537_v48  ;;  %v3540_v53 = vpop.f32.mrb[2].mxu1  ;;  %v1162_v44 = vld [vmem:[%s4937_s27 + $0x1f0] sm:$0xff]  ;;  %v4362_v46 = vpack.c.bf16 %v1147_v43, %v1146_v41  ;;  %v1472_v48 = vld [vmem:[%s5052_s15] sm:$0xff]  ;;  %v1473_v49 = vld [vmem:[%s5052_s15 + $0x8] sm:$0xff]  ;;  %s5297_s27 = scalar_lea.vmem %s5411_s6, %s5287_s19  ;;  %s5359_s19 = scalar_lea.vmem %s5416_s11, %s3498_s16 }
  0xfe   : > { %v3541_v54 = vpop.f32.mrb[3].mxu1  ;;  %v4386_v47 = vpack.c.bf16 %v1163_v45, %v1162_v44  ;;  %v1488_v50 = vld [vmem:[%s5052_s15 + $0x80] sm:$0xff]  ;;  %v1507_v41 = vld [vmem:[%s5052_s15 + $0x118] sm:$0xff]  ;;  %v1522_v43 = vld [vmem:[%s5052_s15 + $0x190] sm:$0xff] }
  0xff   : > { %v1055_v55 = vadd.f32 %v3539_v52, %v1015_v51  ;;  %v1489_v51 = vld [vmem:[%s5052_s15 + $0x88] sm:$0xff]  ;;  %v4389_v52 = vpack.c.bf16 %v1473_v49, %v1472_v48  ;;  %v1474_v54 = vld [vmem:[%s5052_s15 + $0x10] sm:$0xff]  ;;  %v1523_v44 = vld [vmem:[%s5052_s15 + $0x198] sm:$0xff] }
 0x100   : > { %v4413_v53 = vpack.c.bf16 %v1489_v51, %v1488_v50  ;;  %v1509_v48 = vld [vmem:[%s5052_s15 + $0x128] sm:$0xff]  ;;  %v1524_v49 = vld [vmem:[%s5052_s15 + $0x1a0] sm:$0xff] }
 0x101   : > { %v1525_v50 = vld [vmem:[%s5052_s15 + $0x1a8] sm:$0xff] }
 0x119   : > { %v3559_v57 = vpop.f32.mrb[4].mxu0 }
 0x11a   : > { %v3560_v61 = vpop.f32.mrb[5].mxu0 }
 0x11b   : > { %v3561_v63 = vadd.f32 %v3560_v61, %v3559_v57  ;;  %v3562_v0 = vpop.f32.mrb[6].mxu0  ;;  %v1491_v57 = vld [vmem:[%s5052_s15 + $0x98] sm:$0xff]  ;;  %v1477_v61 = vld [vmem:[%s5052_s15 + $0x28] sm:$0xff] }
 0x11c   : > { %v3563_v1 = vpop.f32.mrb[7].mxu0  ;;  %v4416_v59 = vpack.c.bf16 %v1491_v57, %v1490_v56  ;;  %v1493_v0 = vld [vmem:[%s5052_s15 + $0xa8] sm:$0xff]  ;;  %v1527_v56 = vld [vmem:[%s5052_s15 + $0x1b8] sm:$0xff] }
 0x11d   : > { %v5001_v5 = vadd.f32 %v3561_v63, %v1055_v55  ;;  %v1475_v55 = vld [vmem:[%s5052_s15 + $0x18] sm:$0xff]  ;;  %v1492_v63 = vld [vmem:[%s5052_s15 + $0xa0] sm:$0xff]  ;;  %v4395_v1 = vpack.c.bf16 %v1477_v61, %v1476_v60  ;;  %v1513_v60 = vld [vmem:[%s5052_s15 + $0x148] sm:$0xff] }
 0x11e   : > { %v4392_v58 = vpack.c.bf16 %v1475_v55, %v1474_v54  ;;  %v1511_v54 = vld [vmem:[%s5052_s15 + $0x138] sm:$0xff]  ;;  %v1526_v55 = vld [vmem:[%s5052_s15 + $0x1b0] sm:$0xff]  ;;  %v1528_v61 = vld [vmem:[%s5052_s15 + $0x1c0] sm:$0xff] }
 0x11f   : > { %3832 = vmatmul.mubr.f32.vlgmr.msra.gmra.mrb[4].mxu1 %v5001_v5  ;;  %3867 = vmatmul.mubr.f32.vlgmr.msra.gmra.mrb[8].mxu0 %v5001_v5 }
 0x120   : > { %4342 = vmatpush3.bf16.msra.mxu1 %v4341_v2  ;;  %4366 = vmatpush3.bf16.msra.mxu0 %v4365_v3  ;;  %v4419_v2 = vpack.c.bf16 %v1493_v0, %v1492_v63  ;;  %v1478_v3 = vld [vmem:[%s5052_s15 + $0x30] sm:$0xff]  ;;  %v1529_v63 = vld [vmem:[%s5052_s15 + $0x1c8] sm:$0xff] }
 0x121   : > { %4343 = vmatprep.subr.bf16.mxu1 %v4690_v62  ;;  %4367 = vmatprep.subr.bf16.mxu0 %v4690_v62  ;;  %v4398_v8 = vpack.c.bf16 %v1479_v4, %v1478_v3  ;;  %v1515_v3 = vld [vmem:[%s5052_s15 + $0x158] sm:$0xff]  ;;  %v1530_v4 = vld [vmem:[%s5052_s15 + $0x1d0] sm:$0xff] }
 0x122   : > { %3901 = vmatprep.mubr.msk.f32.mxu1 %vm4691_vm0, %v4692_v42  ;;  %3936 = vmatprep.mubr.msk.f32.mxu0 %vm4691_vm0, %v4692_v42 }
 0x124   : > { %4345 = vmatpush3.bf16.msra.mxu1 %v4344_v9  ;;  %4369 = vmatpush3.bf16.msra.mxu0 %v4368_v10  ;;  %v4422_v9 = vpack.c.bf16 %v1495_v7, %v1494_v6  ;;  %v1480_v10 = vld [vmem:[%s5052_s15 + $0x40] sm:$0xff]  ;;  %v1531_v6 = vld [vmem:[%s5052_s15 + $0x1d8] sm:$0xff] }
 0x125   : > { %4346 = vmatprep.subr.bf16.mxu1 %v4690_v62  ;;  %4370 = vmatprep.subr.bf16.mxu0 %v4690_v62  ;;  %v4401_v14 = vpack.c.bf16 %v1481_v11, %v1480_v10  ;;  %v1517_v10 = vld [vmem:[%s5052_s15 + $0x168] sm:$0xff]  ;;  %v1532_v11 = vld [vmem:[%s5052_s15 + $0x1e0] sm:$0xff] }
 0x128   : > { %4348 = vmatpush3.bf16.msra.mxu1 %v4347_v15  ;;  %4372 = vmatpush3.bf16.msra.mxu0 %v4371_v16  ;;  %v4425_v15 = vpack.c.bf16 %v1497_v13, %v1496_v12  ;;  %v1482_v16 = vld [vmem:[%s5052_s15 + $0x50] sm:$0xff]  ;;  %v1533_v12 = vld [vmem:[%s5052_s15 + $0x1e8] sm:$0xff] }
 0x129   : > { %4349 = vmatprep.subr.bf16.mxu1 %v4690_v62  ;;  %4373 = vmatprep.subr.bf16.mxu0 %v4690_v62  ;;  %v4404_v20 = vpack.c.bf16 %v1483_v17, %v1482_v16  ;;  %v1519_v16 = vld [vmem:[%s5052_s15 + $0x178] sm:$0xff]  ;;  %v1534_v17 = vld [vmem:[%s5052_s15 + $0x1f0] sm:$0xff] }
 0x12c   : > { %4351 = vmatpush3.bf16.msra.mxu1 %v4350_v21  ;;  %4375 = vmatpush3.bf16.msra.mxu0 %v4374_v22  ;;  %v4428_v21 = vpack.c.bf16 %v1499_v19, %v1498_v18  ;;  %v1484_v22 = vld [vmem:[%s5052_s15 + $0x60] sm:$0xff]  ;;  %v1535_v18 = vld [vmem:[%s5052_s15 + $0x1f8] sm:$0xff] }
 0x12d   : > { %4352 = vmatprep.subr.bf16.mxu1 %v4690_v62  ;;  %4376 = vmatprep.subr.bf16.mxu0 %v4690_v62  ;;  %v4407_v26 = vpack.c.bf16 %v1485_v23, %v1484_v22  ;;  %v1845_v22 = vld [vmem:[%s5166_s18 + $0x8] sm:$0xff]  ;;  %v1860_v23 = vld [vmem:[%s5166_s18 + $0x80] sm:$0xff] }
 0x130   : > { %4354 = vmatpush3.bf16.msra.mxu1 %v4353_v27  ;;  %4378 = vmatpush3.bf16.msra.mxu0 %v4377_v28  ;;  %v4431_v27 = vpack.c.bf16 %v1501_v25, %v1500_v24  ;;  %v1486_v28 = vld [vmem:[%s5052_s15 + $0x70] sm:$0xff]  ;;  %v1861_v24 = vld [vmem:[%s5166_s18 + $0x88] sm:$0xff] }
 0x131   : > { %4355 = vmatprep.subr.bf16.mxu1 %v4690_v62  ;;  %4379 = vmatprep.subr.bf16.mxu0 %v4690_v62  ;;  %v4410_v32 = vpack.c.bf16 %v1487_v29, %v1486_v28  ;;  %v1847_v28 = vld [vmem:[%s5166_s18 + $0x18] sm:$0xff]  ;;  %v1862_v29 = vld [vmem:[%s5166_s18 + $0x90] sm:$0xff] }
 0x134   : > { %4357 = vmatpush3.bf16.msra.mxu1 %v4356_v33  ;;  %4381 = vmatpush3.bf16.msra.mxu0 %v4380_v34  ;;  %v4434_v33 = vpack.c.bf16 %v1503_v31, %v1502_v30  ;;  %v1504_v34 = vld [vmem:[%s5052_s15 + $0x100] sm:$0xff]  ;;  %v1863_v30 = vld [vmem:[%s5166_s18 + $0x98] sm:$0xff] }
 0x135   : > { %4358 = vmatprep.subr.bf16.mxu1 %v4690_v62  ;;  %4382 = vmatprep.subr.bf16.mxu0 %v4690_v62  ;;  %v4437_v38 = vpack.c.bf16 %v1505_v35, %v1504_v34  ;;  %v1849_v34 = vld [vmem:[%s5166_s18 + $0x28] sm:$0xff]  ;;  %v1864_v35 = vld [vmem:[%s5166_s18 + $0xa0] sm:$0xff] }
 0x138   : > { %4360 = vmatpush3.bf16.msra.mxu1 %v4359_v39  ;;  %4384 = vmatpush3.bf16.msra.mxu0 %v4383_v40  ;;  %v4461_v39 = vpack.c.bf16 %v1521_v37, %v1520_v36  ;;  %v1506_v40 = vld [vmem:[%s5052_s15 + $0x110] sm:$0xff]  ;;  %v1865_v36 = vld [vmem:[%s5166_s18 + $0xa8] sm:$0xff] }
 0x139   : > { %4361 = vmatprep.subr.bf16.mxu1 %v4690_v62  ;;  %4385 = vmatprep.subr.bf16.mxu0 %v4690_v62  ;;  %v4440_v45 = vpack.c.bf16 %v1507_v41, %v1506_v40  ;;  %v1851_v40 = vld [vmem:[%s5166_s18 + $0x38] sm:$0xff]  ;;  %v1866_v41 = vld [vmem:[%s5166_s18 + $0xb0] sm:$0xff] }
 0x13c   : > { %4363 = vmatpush3.bf16.msra.mxu1 %v4362_v46  ;;  %4387 = vmatpush3.bf16.msra.mxu0 %v4386_v47  ;;  %v4464_v46 = vpack.c.bf16 %v1523_v44, %v1522_v43  ;;  %v1508_v47 = vld [vmem:[%s5052_s15 + $0x120] sm:$0xff]  ;;  %v1867_v43 = vld [vmem:[%s5166_s18 + $0xb8] sm:$0xff] }
 0x13d   : > { %4388 = vmatprep.subr.bf16.mxu1 %v4690_v62  ;;  %4412 = vmatprep.subr.bf16.mxu0 %v4690_v62  ;;  %v4443_v51 = vpack.c.bf16 %v1509_v48, %v1508_v47  ;;  %v1853_v47 = vld [vmem:[%s5166_s18 + $0x48] sm:$0xff]  ;;  %v1868_v48 = vld [vmem:[%s5166_s18 + $0xc0] sm:$0xff] }
 0x13f   : > { %3902 = vmatmul.mubr.f32.vlgmr.msra.gmra.mrb[6].mxu1 %v5001_v5  ;;  %3937 = vmatmul.mubr.f32.vlgmr.msra.gmra.mrb[10].mxu0 %v5001_v5 }
 0x140   : > { %4390 = vmatpush3.bf16.msra.mxu1 %v4389_v52  ;;  %4414 = vmatpush3.bf16.msra.mxu0 %v4413_v53  ;;  %v4467_v52 = vpack.c.bf16 %v1525_v50, %v1524_v49  ;;  %v1510_v53 = vld [vmem:[%s5052_s15 + $0x130] sm:$0xff]  ;;  %v1869_v49 = vld [vmem:[%s5166_s18 + $0xc8] sm:$0xff] }
 0x141   : > { %4391 = vmatprep.subr.bf16.mxu1 %v4690_v62  ;;  %4415 = vmatprep.subr.bf16.mxu0 %v4690_v62  ;;  %v4446_v57 = vpack.c.bf16 %v1511_v54, %v1510_v53  ;;  %v1855_v53 = vld [vmem:[%s5166_s18 + $0x58] sm:$0xff]  ;;  %v1870_v54 = vld [vmem:[%s5166_s18 + $0xd0] sm:$0xff] }
 0x142   : > { %3971 = vmatprep.mubr.msk.f32.mxu1 %vm4691_vm0, %v4692_v42  ;;  %4006 = vmatprep.mubr.msk.f32.mxu0 %vm4691_vm0, %v4692_v42 }
 0x144   : > { %4393 = vmatpush3.bf16.msra.mxu1 %v4392_v58  ;;  %4417 = vmatpush3.bf16.msra.mxu0 %v4416_v59  ;;  %v4470_v58 = vpack.c.bf16 %v1527_v56, %v1526_v55  ;;  %v1512_v59 = vld [vmem:[%s5052_s15 + $0x140] sm:$0xff]  ;;  %v1871_v55 = vld [vmem:[%s5166_s18 + $0xd8] sm:$0xff] }
 0x145   : > { %4394 = vmatprep.subr.bf16.mxu1 %v4690_v62  ;;  %4418 = vmatprep.subr.bf16.mxu0 %v4690_v62  ;;  %v4449_v0 = vpack.c.bf16 %v1513_v60, %v1512_v59  ;;  %v1857_v59 = vld [vmem:[%s5166_s18 + $0x68] sm:$0xff]  ;;  %v1872_v60 = vld [vmem:[%s5166_s18 + $0xe0] sm:$0xff] }
 0x148   : > { %4396 = vmatpush3.bf16.msra.mxu1 %v4395_v1  ;;  %4420 = vmatpush3.bf16.msra.mxu0 %v4419_v2  ;;  %v4473_v1 = vpack.c.bf16 %v1529_v63, %v1528_v61  ;;  %v1514_v2 = vld [vmem:[%s5052_s15 + $0x150] sm:$0xff]  ;;  %v1873_v61 = vld [vmem:[%s5166_s18 + $0xe8] sm:$0xff] }
 0x149   : > { %4397 = vmatprep.subr.bf16.mxu1 %v4690_v62  ;;  %4421 = vmatprep.subr.bf16.mxu0 %v4690_v62  ;;  %v4452_v7 = vpack.c.bf16 %v1515_v3, %v1514_v2  ;;  %v1859_v2 = vld [vmem:[%s5166_s18 + $0x78] sm:$0xff]  ;;  %v1874_v3 = vld [vmem:[%s5166_s18 + $0xf0] sm:$0xff] }
 0x14c   : > { %4399 = vmatpush3.bf16.msra.mxu1 %v4398_v8  ;;  %4423 = vmatpush3.bf16.msra.mxu0 %v4422_v9  ;;  %v4476_v8 = vpack.c.bf16 %v1531_v6, %v1530_v4  ;;  %v1516_v9 = vld [vmem:[%s5052_s15 + $0x160] sm:$0xff]  ;;  %v1875_v4 = vld [vmem:[%s5166_s18 + $0xf8] sm:$0xff] }
 0x14d   : > { %4400 = vmatprep.subr.bf16.mxu1 %v4690_v62  ;;  %4424 = vmatprep.subr.bf16.mxu0 %v4690_v62  ;;  %v4455_v13 = vpack.c.bf16 %v1517_v10, %v1516_v9  ;;  %v1877_v9 = vld [vmem:[%s5166_s18 + $0x108] sm:$0xff]  ;;  %v1892_v10 = vld [vmem:[%s5166_s18 + $0x180] sm:$0xff] }
 0x150   : > { %4402 = vmatpush3.bf16.msra.mxu1 %v4401_v14  ;;  %4426 = vmatpush3.bf16.msra.mxu0 %v4425_v15  ;;  %v4479_v14 = vpack.c.bf16 %v1533_v12, %v1532_v11  ;;  %v1518_v15 = vld [vmem:[%s5052_s15 + $0x170] sm:$0xff]  ;;  %v1893_v11 = vld [vmem:[%s5166_s18 + $0x188] sm:$0xff] }
 0x151   : > { %4403 = vmatprep.subr.bf16.mxu1 %v4690_v62  ;;  %4427 = vmatprep.subr.bf16.mxu0 %v4690_v62  ;;  %v4458_v19 = vpack.c.bf16 %v1519_v16, %v1518_v15  ;;  %v1879_v15 = vld [vmem:[%s5166_s18 + $0x118] sm:$0xff]  ;;  %v1894_v16 = vld [vmem:[%s5166_s18 + $0x190] sm:$0xff] }
 0x154   : > { %4405 = vmatpush3.bf16.msra.mxu1 %v4404_v20  ;;  %4429 = vmatpush3.bf16.msra.mxu0 %v4428_v21  ;;  %v4482_v20 = vpack.c.bf16 %v1535_v18, %v1534_v17  ;;  %v1844_v21 = vld [vmem:[%s5166_s18] sm:$0xff]  ;;  %v1895_v17 = vld [vmem:[%s5166_s18 + $0x198] sm:$0xff] }
 0x155   : > { %4406 = vmatprep.subr.bf16.mxu1 %v4690_v62  ;;  %4430 = vmatprep.subr.bf16.mxu0 %v4690_v62  ;;  %v4485_v25 = vpack.c.bf16 %v1845_v22, %v1844_v21  ;;  %v1881_v21 = vld [vmem:[%s5166_s18 + $0x128] sm:$0xff]  ;;  %v1896_v22 = vld [vmem:[%s5166_s18 + $0x1a0] sm:$0xff] }
 0x158   : > { %4408 = vmatpush3.bf16.msra.mxu1 %v4407_v26  ;;  %4432 = vmatpush3.bf16.msra.mxu0 %v4431_v27  ;;  %v4509_v26 = vpack.c.bf16 %v1861_v24, %v1860_v23  ;;  %v1846_v27 = vld [vmem:[%s5166_s18 + $0x10] sm:$0xff]  ;;  %v1897_v23 = vld [vmem:[%s5166_s18 + $0x1a8] sm:$0xff] }
 0x159   : > { %4409 = vmatprep.subr.bf16.mxu1 %v4690_v62  ;;  %4433 = vmatprep.subr.bf16.mxu0 %v4690_v62  ;;  %v4488_v31 = vpack.c.bf16 %v1847_v28, %v1846_v27  ;;  %v1883_v27 = vld [vmem:[%s5166_s18 + $0x138] sm:$0xff]  ;;  %v1898_v28 = vld [vmem:[%s5166_s18 + $0x1b0] sm:$0xff] }
 0x15c   : > { %4411 = vmatpush3.bf16.msra.mxu1 %v4410_v32  ;;  %4435 = vmatpush3.bf16.msra.mxu0 %v4434_v33  ;;  %v4512_v32 = vpack.c.bf16 %v1863_v30, %v1862_v29  ;;  %v1848_v33 = vld [vmem:[%s5166_s18 + $0x20] sm:$0xff]  ;;  %v1899_v29 = vld [vmem:[%s5166_s18 + $0x1b8] sm:$0xff] }
 0x15d   : > { %4436 = vmatprep.subr.bf16.mxu1 %v4690_v62  ;;  %4460 = vmatprep.subr.bf16.mxu0 %v4690_v62  ;;  %v4491_v37 = vpack.c.bf16 %v1849_v34, %v1848_v33  ;;  %v1885_v33 = vld [vmem:[%s5166_s18 + $0x148] sm:$0xff]  ;;  %v1900_v34 = vld [vmem:[%s5166_s18 + $0x1c0] sm:$0xff] }
 0x15f   : > { %3972 = vmatmul.mubr.f32.vlgmr.msra.gmra.mrb[8].mxu1 %v5001_v5  ;;  %4007 = vmatmul.mubr.f32.vlgmr.msra.gmra.mrb[12].mxu0 %v5001_v5 }
 0x160   : > { %4438 = vmatpush3.bf16.msra.mxu1 %v4437_v38  ;;  %4462 = vmatpush3.bf16.msra.mxu0 %v4461_v39  ;;  %v4515_v38 = vpack.c.bf16 %v1865_v36, %v1864_v35  ;;  %v1850_v39 = vld [vmem:[%s5166_s18 + $0x30] sm:$0xff]  ;;  %v1901_v35 = vld [vmem:[%s5166_s18 + $0x1c8] sm:$0xff] }
 0x161   : > { %4439 = vmatprep.subr.bf16.mxu1 %v4690_v62  ;;  %4463 = vmatprep.subr.bf16.mxu0 %v4690_v62  ;;  %v4494_v44 = vpack.c.bf16 %v1851_v40, %v1850_v39  ;;  %v1887_v39 = vld [vmem:[%s5166_s18 + $0x158] sm:$0xff]  ;;  %v1902_v40 = vld [vmem:[%s5166_s18 + $0x1d0] sm:$0xff] }
 0x162   : > { %4041 = vmatprep.mubr.msk.f32.mxu1 %vm4691_vm0, %v4692_v42  ;;  %4076 = vmatprep.mubr.msk.f32.mxu0 %vm4691_vm0, %v4692_v42 }
 0x164   : > { %4441 = vmatpush3.bf16.msra.mxu1 %v4440_v45  ;;  %4465 = vmatpush3.bf16.msra.mxu0 %v4464_v46  ;;  %v4518_v45 = vpack.c.bf16 %v1867_v43, %v1866_v41  ;;  %v1852_v46 = vld [vmem:[%s5166_s18 + $0x40] sm:$0xff]  ;;  %v1903_v41 = vld [vmem:[%s5166_s18 + $0x1d8] sm:$0xff] }
 0x165   : > { %4442 = vmatprep.subr.bf16.mxu1 %v4690_v62  ;;  %4466 = vmatprep.subr.bf16.mxu0 %v4690_v62  ;;  %v4497_v50 = vpack.c.bf16 %v1853_v47, %v1852_v46  ;;  %v1889_v46 = vld [vmem:[%s5166_s18 + $0x168] sm:$0xff]  ;;  %v1904_v47 = vld [vmem:[%s5166_s18 + $0x1e0] sm:$0xff] }
 0x168   : > { %4444 = vmatpush3.bf16.msra.mxu1 %v4443_v51  ;;  %4468 = vmatpush3.bf16.msra.mxu0 %v4467_v52  ;;  %v4521_v51 = vpack.c.bf16 %v1869_v49, %v1868_v48  ;;  %v1854_v52 = vld [vmem:[%s5166_s18 + $0x50] sm:$0xff]  ;;  %v1905_v48 = vld [vmem:[%s5166_s18 + $0x1e8] sm:$0xff] }
 0x169   : > { %4445 = vmatprep.subr.bf16.mxu1 %v4690_v62  ;;  %4469 = vmatprep.subr.bf16.mxu0 %v4690_v62  ;;  %v4500_v56 = vpack.c.bf16 %v1855_v53, %v1854_v52  ;;  %v1891_v52 = vld [vmem:[%s5166_s18 + $0x178] sm:$0xff]  ;;  %v1906_v53 = vld [vmem:[%s5166_s18 + $0x1f0] sm:$0xff] }
 0x16c   : > { %4447 = vmatpush3.bf16.msra.mxu1 %v4446_v57  ;;  %4471 = vmatpush3.bf16.msra.mxu0 %v4470_v58  ;;  %v4524_v57 = vpack.c.bf16 %v1871_v55, %v1870_v54  ;;  %v1856_v58 = vld [vmem:[%s5166_s18 + $0x60] sm:$0xff]  ;;  %v1907_v54 = vld [vmem:[%s5166_s18 + $0x1f8] sm:$0xff] }
 0x16d   : > { %4448 = vmatprep.subr.bf16.mxu1 %v4690_v62  ;;  %4472 = vmatprep.subr.bf16.mxu0 %v4690_v62  ;;  %v4503_v63 = vpack.c.bf16 %v1857_v59, %v1856_v58 }
 0x170   : > { %4450 = vmatpush3.bf16.msra.mxu1 %v4449_v0  ;;  %4474 = vmatpush3.bf16.msra.mxu0 %v4473_v1  ;;  %v4527_v0 = vpack.c.bf16 %v1873_v61, %v1872_v60  ;;  %v1858_v1 = vld [vmem:[%s5166_s18 + $0x70] sm:$0xff] }
 0x171   : > { %4451 = vmatprep.subr.bf16.mxu1 %v4690_v62  ;;  %4475 = vmatprep.subr.bf16.mxu0 %v4690_v62  ;;  %v4506_v6 = vpack.c.bf16 %v1859_v2, %v1858_v1 }
 0x174   : > { %4453 = vmatpush3.bf16.msra.mxu1 %v4452_v7  ;;  %4477 = vmatpush3.bf16.msra.mxu0 %v4476_v8  ;;  %v4530_v7 = vpack.c.bf16 %v1875_v4, %v1874_v3  ;;  %v1876_v8 = vld [vmem:[%s5166_s18 + $0x100] sm:$0xff] }
 0x175   : > { %4454 = vmatprep.subr.bf16.mxu1 %v4690_v62  ;;  %4478 = vmatprep.subr.bf16.mxu0 %v4690_v62  ;;  %v4533_v12 = vpack.c.bf16 %v1877_v9, %v1876_v8  ;;  %v3463_v4 = vld [vmem:[%s5297_s27] ss:$0 sm:$0xff]  ;;  %v3468_v9 = vld [vmem:[%s542_s22 + $0x1] ss:$0 sm:$0xff] }
 0x178   : > { %4456 = vmatpush3.bf16.msra.mxu1 %v4455_v13  ;;  %4480 = vmatpush3.bf16.msra.mxu0 %v4479_v14  ;;  %v4557_v13 = vpack.c.bf16 %v1893_v11, %v1892_v10  ;;  %v1878_v14 = vld [vmem:[%s5166_s18 + $0x110] sm:$0xff]  ;;  %v3464_v11 = vld [vmem:[%s5297_s27 + $0x1] ss:$0 sm:$0xff] }
 0x179   : > { %4457 = vmatprep.subr.bf16.mxu1 %v4690_v62  ;;  %4481 = vmatprep.subr.bf16.mxu0 %v4690_v62  ;;  %v4536_v18 = vpack.c.bf16 %v1879_v15, %v1878_v14  ;;  %v3469_v14 = vld [vmem:[%s542_s22 + $0x2] ss:$0 sm:$0xff] }
 0x17c   : > { %4459 = vmatpush3.bf16.msra.mxu1 %v4458_v19  ;;  %4483 = vmatpush3.bf16.msra.mxu0 %v4482_v20  ;;  %v4560_v19 = vpack.c.bf16 %v1895_v17, %v1894_v16  ;;  %v1880_v20 = vld [vmem:[%s5166_s18 + $0x120] sm:$0xff] }
 0x17d   : > { %4484 = vmatprep.subr.bf16.mxu1 %v4690_v62  ;;  %4508 = vmatprep.subr.bf16.mxu0 %v4690_v62  ;;  %v4539_v24 = vpack.c.bf16 %v1881_v21, %v1880_v20  ;;  %v3465_v17 = vld [vmem:[%s5297_s27 + $0x2] ss:$0 sm:$0xff]  ;;  %v3470_v21 = vld [vmem:[%s542_s22 + $0x3] ss:$0 sm:$0xff] }
 0x17f   : > { %4042 = vmatmul.mubr.f32.vlgmr.msra.gmra.mrb[10].mxu1 %v5001_v5  ;;  %4077 = vmatmul.mubr.f32.vlgmr.msra.gmra.mrb[14].mxu0 %v5001_v5 }
 0x180   : > { %4486 = vmatpush3.bf16.msra.mxu1 %v4485_v25  ;;  %4510 = vmatpush3.bf16.msra.mxu0 %v4509_v26  ;;  %v4563_v25 = vpack.c.bf16 %v1897_v23, %v1896_v22  ;;  %v1882_v26 = vld [vmem:[%s5166_s18 + $0x130] sm:$0xff]  ;;  %v3466_v23 = vld [vmem:[%s5297_s27 + $0x3] ss:$0 sm:$0xff]  ;;  %s3407_s27 = sshll.u32 %s5420_s26, 1 }
 0x181   : > { %4487 = vmatprep.subr.bf16.mxu1 %v4690_v62  ;;  %4511 = vmatprep.subr.bf16.mxu0 %v4690_v62  ;;  %v4542_v30 = vpack.c.bf16 %v1883_v27, %v1882_v26  ;;  %v3471_v26 = vld [vmem:[%s551_s30] ss:$0 sm:$0xff]  ;;  %v3472_v27 = vld [vmem:[%s551_s30 + $0x1] ss:$0 sm:$0xff] }
 0x182   : > { %4111 = vmatprep.mubr.msk.f32.mxu1 %vm4691_vm0, %v4692_v42  ;;  %4146 = vmatprep.mubr.msk.f32.mxu0 %vm4691_vm0, %v4692_v42 }
 0x184   : > { %4489 = vmatpush3.bf16.msra.mxu1 %v4488_v31  ;;  %4513 = vmatpush3.bf16.msra.mxu0 %v4512_v32  ;;  %v4566_v31 = vpack.c.bf16 %v1899_v29, %v1898_v28  ;;  %v1884_v32 = vld [vmem:[%s5166_s18 + $0x140] sm:$0xff] }
 0x185   : > { %4490 = vmatprep.subr.bf16.mxu1 %v4690_v62  ;;  %4514 = vmatprep.subr.bf16.mxu0 %v4690_v62  ;;  %v4545_v36 = vpack.c.bf16 %v1885_v33, %v1884_v32 }
 0x188   : > { %4492 = vmatpush3.bf16.msra.mxu1 %v4491_v37  ;;  %4516 = vmatpush3.bf16.msra.mxu0 %v4515_v38  ;;  %v4569_v37 = vpack.c.bf16 %v1901_v35, %v1900_v34  ;;  %v1886_v38 = vld [vmem:[%s5166_s18 + $0x150] sm:$0xff]  ;;  %v3473_v34 = vld [vmem:[%s551_s30 + $0x2] ss:$0 sm:$0xff]  ;;  %v3474_v35 = vld [vmem:[%s551_s30 + $0x3] ss:$0 sm:$0xff]  ;;  %s563_s30 = scalar_lea.vmem %s5418_s13, %s3407_s27 }
 0x189   : > { %4493 = vmatprep.subr.bf16.mxu1 %v4690_v62  ;;  %4517 = vmatprep.subr.bf16.mxu0 %v4690_v62  ;;  %v4548_v43 = vpack.c.bf16 %v1887_v39, %v1886_v38 }
 0x18c   : > { %4495 = vmatpush3.bf16.msra.mxu1 %v4494_v44  ;;  %4519 = vmatpush3.bf16.msra.mxu0 %v4518_v45  ;;  %v4572_v44 = vpack.c.bf16 %v1903_v41, %v1902_v40  ;;  %v1888_v45 = vld [vmem:[%s5166_s18 + $0x160] sm:$0xff] }
 0x18d   : > { %4496 = vmatprep.subr.bf16.mxu1 %v4690_v62  ;;  %4520 = vmatprep.subr.bf16.mxu0 %v4690_v62  ;;  %v4551_v49 = vpack.c.bf16 %v1889_v46, %v1888_v45 }
 0x190   : > { %4498 = vmatpush3.bf16.msra.mxu1 %v4497_v50  ;;  %4522 = vmatpush3.bf16.msra.mxu0 %v4521_v51  ;;  %v4575_v50 = vpack.c.bf16 %v1905_v48, %v1904_v47  ;;  %v1890_v51 = vld [vmem:[%s5166_s18 + $0x170] sm:$0xff] }
 0x191   : > { %4499 = vmatprep.subr.bf16.mxu1 %v4690_v62  ;;  %4523 = vmatprep.subr.bf16.mxu0 %v4690_v62  ;;  %v4554_v55 = vpack.c.bf16 %v1891_v52, %v1890_v51 }
 0x194   : > { %4501 = vmatpush3.bf16.msra.mxu1 %v4500_v56  ;;  %4525 = vmatpush3.bf16.msra.mxu0 %v4524_v57  ;;  %v4578_v56 = vpack.c.bf16 %v1907_v54, %v1906_v53 }
 0x195   : > { %4502 = vmatprep.subr.bf16.mxu1 %v4690_v62  ;;  %4526 = vmatprep.subr.bf16.mxu0 %v4690_v62 }
 0x198   : > { %4504 = vmatpush3.bf16.msra.mxu1 %v4503_v63  ;;  %4528 = vmatpush3.bf16.msra.mxu0 %v4527_v0 }
 0x199   : > { %4505 = vmatprep.subr.bf16.mxu1 %v4690_v62  ;;  %4529 = vmatprep.subr.bf16.mxu0 %v4690_v62 }
 0x19c   : > { %4507 = vmatpush3.bf16.msra.mxu1 %v4506_v6  ;;  %4531 = vmatpush3.bf16.msra.mxu0 %v4530_v7 }
 0x19d   : > { %4532 = vmatprep.subr.bf16.mxu1 %v4690_v62  ;;  %4556 = vmatprep.subr.bf16.mxu0 %v4690_v62 }
 0x19f   : > { %4112 = vmatmul.mubr.f32.vlgmr.msra.gmra.mrb[12].mxu1 %v5001_v5  ;;  %4147 = vmatmul.mubr.f32.vlgmr.msra.gmra.mrb[16].mxu0 %v5001_v5 }
 0x1a0   : > { %4534 = vmatpush3.bf16.msra.mxu1 %v4533_v12  ;;  %4558 = vmatpush3.bf16.msra.mxu0 %v4557_v13 }
 0x1a1   : > { %4535 = vmatprep.subr.bf16.mxu1 %v4690_v62  ;;  %4559 = vmatprep.subr.bf16.mxu0 %v4690_v62 }
 0x1a2   : > { %4181 = vmatprep.mubr.msk.f32.mxu1 %vm4691_vm0, %v4692_v42  ;;  %4216 = vmatprep.mubr.msk.f32.mxu0 %vm4691_vm0, %v4692_v42 }
 0x1a4   : > { %4537 = vmatpush3.bf16.msra.mxu1 %v4536_v18  ;;  %4561 = vmatpush3.bf16.msra.mxu0 %v4560_v19 }
 0x1a5   : > { %4538 = vmatprep.subr.bf16.mxu1 %v4690_v62  ;;  %4562 = vmatprep.subr.bf16.mxu0 %v4690_v62 }
 0x1a8   : > { %4540 = vmatpush3.bf16.msra.mxu1 %v4539_v24  ;;  %4564 = vmatpush3.bf16.msra.mxu0 %v4563_v25 }
 0x1a9   : > { %4541 = vmatprep.subr.bf16.mxu1 %v4690_v62  ;;  %4565 = vmatprep.subr.bf16.mxu0 %v4690_v62 }
 0x1ac   : > { %4543 = vmatpush3.bf16.msra.mxu1 %v4542_v30  ;;  %4567 = vmatpush3.bf16.msra.mxu0 %v4566_v31 }
 0x1ad   : > { %4544 = vmatprep.subr.bf16.mxu1 %v4690_v62  ;;  %4568 = vmatprep.subr.bf16.mxu0 %v4690_v62 }
 0x1b0   : > { %4546 = vmatpush3.bf16.msra.mxu1 %v4545_v36  ;;  %4570 = vmatpush3.bf16.msra.mxu0 %v4569_v37 }
 0x1b1   : > { %4547 = vmatprep.subr.bf16.mxu1 %v4690_v62  ;;  %4571 = vmatprep.subr.bf16.mxu0 %v4690_v62 }
 0x1b4   : > { %4549 = vmatpush3.bf16.msra.mxu1 %v4548_v43  ;;  %4573 = vmatpush3.bf16.msra.mxu0 %v4572_v44  ;;  %v2216_v43 = vld [vmem:[%s5409_s4] sm:$0xff] }
 0x1b5   : > { %4550 = vmatprep.subr.bf16.mxu1 %v4690_v62  ;;  %4574 = vmatprep.subr.bf16.mxu0 %v4690_v62 }
 0x1b8   : > { %4552 = vmatpush3.bf16.msra.mxu1 %v4551_v49  ;;  %4576 = vmatpush3.bf16.msra.mxu0 %v4575_v50 }
 0x1b9   : > { %4553 = vmatprep.subr.bf16.mxu1 %v4690_v62  ;;  %4577 = vmatprep.subr.bf16.mxu0 %v4690_v62 }
 0x1bc   : > { %4555 = vmatpush3.bf16.msra.mxu1 %v4554_v55  ;;  %4579 = vmatpush3.bf16.msra.mxu0 %v4578_v56 }
 0x1bd   : > { %4219 = vmatprep.subr.mxu1 %v4692_v42  ;;  %4583 = vmatprep.subr.bf16.mxu0 %v4690_v62 }
 0x1bf   : > { %4182 = vmatmul.mubr.f32.vlgmr.msra.gmra.mrb[14].mxu1 %v5001_v5  ;;  %4217 = vmatmul.mubr.f32.vlgmr.msra.gmra.mrb[18].mxu0 %v5001_v5  ;;  %v3467_v5 = vld [vmem:[%s542_s22] ss:$0 sm:$0xff] }
 0x1c0   : > { %4221 = vmatprep.mubr.msk.f32.mxu1 %vm4691_vm0, %v4692_v42  ;;  %4270 = vmatprep.mubr.msk.f32.mxu0 %vm4691_vm0, %v4692_v42 }
 0x1f2   : > { %v1258_v57 = vpop.f32.mrb[4].mxu1  ;;  %v1328_v58 = vpop.f32.mrb[8].mxu0 }
 0x1f3   : > { %v3833_v59 = vpop.f32.mrb[5].mxu1  ;;  %v3868_v60 = vpop.f32.mrb[9].mxu0  ;;  %v1259_v10 = vadd.f32 %v3463_v4, %v1258_v57  ;;  %v1329_v13 = vadd.f32 %v3464_v11, %v1328_v58 }
 0x212   : > { %v1398_v61 = vpop.f32.mrb[6].mxu1  ;;  %v1468_v63 = vpop.f32.mrb[10].mxu0 }
 0x213   : > { %v3903_v0 = vpop.f32.mrb[7].mxu1  ;;  %v3938_v1 = vpop.f32.mrb[11].mxu0  ;;  %v1399_v22 = vadd.f32 %v3465_v17, %v1398_v61  ;;  %v1469_v25 = vadd.f32 %v3466_v23, %v1468_v63 }
 0x232   : > { %v1630_v2 = vpop.f32.mrb[8].mxu1  ;;  %v1700_v3 = vpop.f32.mrb[12].mxu0 }
 0x233   : > { %v1631_v6 = vadd.f32 %v3467_v5, %v1630_v2  ;;  %v3973_v7 = vpop.f32.mrb[9].mxu1  ;;  %v4008_v8 = vpop.f32.mrb[13].mxu0  ;;  %v1701_v12 = vadd.f32 %v3468_v9, %v1700_v3 }
 0x235   : > { %4220 = vmatpush3.xpose.msk.msra.mxu1 %vm2217_vm1, %v1631_v6 }
 0x236   : > { %4224 = vmatprep.subr.mxu1 %v4692_v42 }
 0x238   : > { %4222 = vmatmul.mubr.msk.f32.vlgmr.msra.gmra.mrb[16].mxu1 %vm2217_vm1, %v1259_v10 }
 0x239   : > { %4225 = vmatpush3.xpose.msk.msra.mxu1 %vm2217_vm1, %v1701_v12  ;;  %4226 = vmatprep.mubr.msk.f32.mxu1 %vm4691_vm0, %v4692_v42 }
 0x23a   : > { %4229 = vmatprep.subr.mxu1 %v4692_v42 }
 0x23c   : > { %4227 = vmatmul.mubr.msk.f32.vlgmr.msra.gmra.mrb[18].mxu1 %vm2217_vm1, %v1329_v13 }
 0x23d   : > { %4231 = vmatprep.mubr.msk.f32.mxu1 %vm4691_vm0, %v4692_v42 }
 0x252   : > { %v1770_v15 = vpop.f32.mrb[10].mxu1  ;;  %v1840_v16 = vpop.f32.mrb[14].mxu0 }
 0x253   : > { %v1771_v18 = vadd.f32 %v3469_v14, %v1770_v15  ;;  %v4043_v19 = vpop.f32.mrb[11].mxu1  ;;  %v4078_v20 = vpop.f32.mrb[15].mxu0  ;;  %v1841_v24 = vadd.f32 %v3470_v21, %v1840_v16 }
 0x255   : > { %4230 = vmatpush3.xpose.msk.msra.mxu1 %vm2217_vm1, %v1771_v18 }
 0x256   : > { %4234 = vmatprep.subr.mxu1 %v4692_v42 }
 0x258   : > { %4232 = vmatmul.mubr.msk.f32.vlgmr.msra.gmra.mrb[20].mxu1 %vm2217_vm1, %v1399_v22 }
 0x259   : > { %4235 = vmatpush3.xpose.msk.msra.mxu1 %vm2217_vm1, %v1841_v24  ;;  %4236 = vmatprep.mubr.msk.f32.mxu1 %vm4691_vm0, %v4692_v42 }
 0x25a   : > { %4239 = vmatprep.subr.mxu1 %v4692_v42 }
 0x25c   : > { %4237 = vmatmul.mubr.msk.f32.vlgmr.msra.gmra.mrb[22].mxu1 %vm2217_vm1, %v1469_v25 }
 0x25d   : > { %4241 = vmatprep.mubr.msk.f32.mxu1 %vm4691_vm0, %v4692_v42 }
 0x272   : > { %v2002_v28 = vpop.f32.mrb[12].mxu1  ;;  %v2072_v29 = vpop.f32.mrb[16].mxu0 }
 0x273   : > { %v2003_v30 = vadd.f32 %v3471_v26, %v2002_v28  ;;  %v5327_v31 = vadd.f32 %v3472_v27, %v2072_v29  ;;  %v4113_v32 = vpop.f32.mrb[13].mxu1  ;;  %v4148_v33 = vpop.f32.mrb[17].mxu0  ;;  %v2859_v27 = vld [vmem:[%s5359_s19] sm:$0xff]  ;;  %v2860_v28 = vld [vmem:[%s5359_s19 + $0x8] sm:$0xff] }
 0x274   : > { %v2861_v32 = vld [vmem:[%s5359_s19 + $0x10] sm:$0xff]  ;;  %v2862_v33 = vld [vmem:[%s5359_s19 + $0x18] sm:$0xff] }
 0x275   : > { %4240 = vmatpush3.msra.mxu1 %v2003_v30  ;;  %v4581_v30 = vpack.c.bf16 %v2860_v28, %v2859_v27 }
 0x276   : > { %4244 = vmatprep.subr.mxu1 %v4692_v42 }
 0x292   : > { %v2142_v36 = vpop.f32.mrb[14].mxu1  ;;  %v2212_v37 = vpop.f32.mrb[18].mxu0 }
 0x293   : > { %v5330_v38 = vadd.f32 %v3473_v34, %v2142_v36  ;;  %v5332_v39 = vadd.f32 %v3474_v35, %v2212_v37  ;;  %v4183_v40 = vpop.f32.mrb[15].mxu1  ;;  %v4218_v41 = vpop.f32.mrb[19].mxu0  ;;  %v4584_v34 = vpack.c.bf16 %v2862_v33, %v2861_v32  ;;  %v2863_v35 = vld [vmem:[%s5359_s19 + $0x20] sm:$0xff]  ;;  %v2864_v36 = vld [vmem:[%s5359_s19 + $0x28] sm:$0xff] }
 0x295   : > { %4585 = vmatpush3.bf16.msra.mxu0 %v4584_v34 }
 0x296   : > { %4586 = vmatprep.subr.bf16.mxu0 %v4690_v62 }
 0x30b   : > { %v2290_v44 = vpop.f32.mrb[16].mxu1 }
 0x30c   : > { %v2291_v45 = vadd.f32 %v2290_v44, %v2216_v43  ;;  %v4223_v46 = vpop.f32.mrb[17].mxu1  ;;  %v2866_v44 = vld [vmem:[%s5359_s19 + $0x38] sm:$0xff] }
 0x30e   : > { %v2523_v47 = vsel %vm2522_vm2, %v2291_v45, -inf }
 0x30f   : > { %2524 = vmax.xlane.f32.xlu0 %v2523_v47  ;;  %v2366_v48 = vpop.f32.mrb[18].mxu1 }
 0x310   : > { %v2367_v49 = vadd.f32 %v2366_v48, %v2216_v43  ;;  %v4228_v50 = vpop.f32.mrb[19].mxu1 }
 0x312   : > { %v2526_v51 = vsel %vm2522_vm2, %v2367_v49, -inf }
 0x313   : > { %2527 = vmax.xlane.f32.xlu0 %v2526_v51 }
 0x32b   : > { %v2442_v52 = vpop.f32.mrb[20].mxu1 }
 0x32c   : > { %v2443_v53 = vadd.f32 %v2442_v52, %v2216_v43  ;;  %v4233_v54 = vpop.f32.mrb[21].mxu1 }
 0x32d   : > { %v3162_v54 = vld [vmem:[%s5408_s3] sm:$0x3] }
 0x32e   : > { %v2529_v55 = vsel %vm2522_vm2, %v2443_v53, -inf }
 0x32f   : > { %2530 = vmax.xlane.f32.xlu1 %v2529_v55  ;;  %v2518_v56 = vpop.f32.mrb[22].mxu1 }
 0x330   : > { %v2519_v57 = vadd.f32 %v2518_v56, %v2216_v43  ;;  %v4238_v58 = vpop.f32.mrb[23].mxu1  ;;  %v2865_v43 = vld [vmem:[%s5359_s19 + $0x30] sm:$0xff] }
 0x332   : > { %v2532_v59 = vsel %vm2522_vm2, %v2519_v57, -inf }
 0x333   : > { %2533 = vmax.xlane.f32.xlu1 %v2532_v59 }
 0x39c   : > { %v2525_v60 = vpop.xlane.xlu0 %2524 }
 0x39d   : > { %v2535_v61 = vsub.f32 %v2291_v45, %v2525_v60  ;;  %v4590_v45 = vpack.c.bf16 %v2866_v44, %v2865_v43 }
 0x39f   : > { %v2539_v63 = vmul.f32 1.442695, %v2535_v61 }
 0x3a0   : > { %v2528_v0 = vpop.xlane.xlu0 %2527 }
 0x3a1   : > { %4662 = vpow2.f32 %v2539_v63  ;;  %v2536_v1 = vsub.f32 %v2367_v49, %v2528_v0 }
 0x3a3   : > { %v2541_v5 = vmul.f32 1.442695, %v2536_v1 }
 0x3a5   : > { %4664 = vpow2.f32 %v2541_v5 }
 0x3ab   : > { %v4663_v2 = vpop.eup %4662 }
 0x3ac   : > { %v2547_v3 = vsel %vm2522_vm2, %v4663_v2, 0.0 }
 0x3ad   : > { %2548 = vadd.xlane.f32.xlu0 %v2547_v3 }
 0x3af   : > { %v4665_v4 = vpop.eup %4664 }
 0x3b0   : > { %v2550_v6 = vsel %vm2522_vm2, %v4665_v4, 0.0 }
 0x3b1   : > { %2551 = vadd.xlane.f32.xlu1 %v2550_v6 }
 0x3bc   : > { %v2531_v7 = vpop.xlane.xlu1 %2530 }
 0x3bd   : > { %v2537_v8 = vsub.f32 %v2443_v53, %v2531_v7 }
 0x3bf   : > { %v2543_v9 = vmul.f32 1.442695, %v2537_v8 }
 0x3c0   : > { %v2534_v10 = vpop.xlane.xlu1 %2533 }
 0x3c1   : > { %4666 = vpow2.f32 %v2543_v9  ;;  %v2538_v11 = vsub.f32 %v2519_v57, %v2534_v10 }
 0x3c3   : > { %v2545_v12 = vmul.f32 1.442695, %v2538_v11 }
 0x3c5   : > { %4668 = vpow2.f32 %v2545_v12 }
 0x3cb   : > { %v4667_v13 = vpop.eup %4666 }
 0x3cc   : > { %v2553_v14 = vsel %vm2522_vm2, %v4667_v13, 0.0 }
 0x3cd   : > { %2554 = vadd.xlane.f32.xlu0 %v2553_v14 }
 0x3cf   : > { %v4669_v15 = vpop.eup %4668 }
 0x3d0   : > { %v2556_v16 = vsel %vm2522_vm2, %v4669_v15, 0.0 }
 0x3d1   : > { %2557 = vadd.xlane.f32.xlu1 %v2556_v16 }
 0x43a   : > { %v2549_v17 = vpop.xlane.xlu0 %2548 }
 0x43b   : > { %4670 = vrcp.f32 %v2549_v17 }
 0x43e   : > { %v2552_v18 = vpop.xlane.xlu1 %2551 }
 0x43f   : > { %4672 = vrcp.f32 %v2552_v18 }
 0x445   : > { %v4671_v19 = vpop.eup %4670 }
 0x446   : > { %v2563_v20 = vmul.f32 %v4671_v19, %v4663_v2 }
 0x448   : > { %4242 = vmatmul.mubr.msk.f32.vlgmr.msra.gmra.mrb[24].mxu1 %vm2522_vm2, %v2563_v20 }
 0x449   : > { %v4673_v21 = vpop.eup %4672  ;;  %4245 = vmatpush3.msra.mxu1 %v5327_v31  ;;  %4246 = vmatprep.mubr.msk.f32.mxu1 %vm4691_vm0, %v4692_v42 }
 0x44a   : > { %v2564_v22 = vmul.f32 %v4673_v21, %v4665_v4  ;;  %4249 = vmatprep.subr.mxu1 %v4692_v42 }
 0x44c   : > { %4247 = vmatmul.mubr.msk.f32.vlgmr.msra.gmra.mrb[26].mxu1 %vm2522_vm2, %v2564_v22 }
 0x44d   : > { %4250 = vmatpush3.msra.mxu1 %v5330_v38  ;;  %4251 = vmatprep.mubr.msk.f32.mxu1 %vm4691_vm0, %v4692_v42 }
 0x44e   : > { %4254 = vmatprep.subr.mxu1 %v4692_v42 }
 0x45a   : > { %v2555_v23 = vpop.xlane.xlu0 %2554 }
 0x45b   : > { %4674 = vrcp.f32 %v2555_v23 }
 0x45e   : > { %v2558_v24 = vpop.xlane.xlu1 %2557 }
 0x45f   : > { %4676 = vrcp.f32 %v2558_v24 }
 0x465   : > { %v4675_v25 = vpop.eup %4674 }
 0x466   : > { %v2565_v26 = vmul.f32 %v4675_v25, %v4667_v13 }
 0x468   : > { %4252 = vmatmul.mubr.msk.f32.vlgmr.msra.gmra.mrb[28].mxu1 %vm2522_vm2, %v2565_v26 }
 0x469   : > { %v4677_v29 = vpop.eup %4676  ;;  %4255 = vmatpush3.msra.mxu1 %v5332_v39  ;;  %4256 = vmatprep.mubr.msk.f32.mxu1 %vm4691_vm0, %v4692_v42  ;;  %v4587_v39 = vpack.c.bf16 %v2864_v36, %v2863_v35 }
 0x46a   : > { %v2566_v31 = vmul.f32 %v4677_v29, %v4669_v15  ;;  %4580 = vmatprep.subr.bf16.mxu1 %v4690_v62 }
 0x46c   : > { %4257 = vmatmul.mubr.msk.f32.vlgmr.msra.gmra.mrb[30].mxu1 %vm2522_vm2, %v2566_v31 }
 0x46d   : > { %4582 = vmatpush3.bf16.msra.mxu1 %v4581_v30  ;;  %4263 = vmatprep.mubr.msk.f32.mxu1 %vm4691_vm0, %v4692_v42 }
 0x46e   : > { %4287 = vmatprep.subr.mxu1 %v4692_v42 }
 0x51b   : > { %v2636_v37 = vpop.f32.mrb[24].mxu1 }
 0x51c   : > { %v4243_v38 = vpop.f32.mrb[25].mxu1  ;;  %4264 = vmatmul.mubr.msk.f32.vlgmr.msra.gmra.mrb[32].mxu1 %vm2217_vm1, %v2636_v37 }
 0x51d   : > { %4289 = vmatprep.mubr.msk.f32.mxu1 %vm4691_vm0, %v4692_v42 }
 0x51f   : > { %v2709_v40 = vpop.f32.mrb[26].mxu1 }
 0x520   : > { %v4248_v41 = vpop.f32.mrb[27].mxu1  ;;  %4271 = vmatmul.mubr.msk.f32.vlgmr.msra.gmra.mrb[20].mxu0 %vm2217_vm1, %v2709_v40 }
 0x521   : > { %4588 = vmatpush3.bf16.msra.mxu0 %v4587_v39  ;;  %4277 = vmatprep.mubr.msk.f32.mxu0 %vm4691_vm0, %v4692_v42 }
 0x522   : > { %4589 = vmatprep.subr.bf16.mxu0 %v4690_v62 }
 0x53b   : > { %v2782_v46 = vpop.f32.mrb[28].mxu1 }
 0x53c   : > { %v4253_v47 = vpop.f32.mrb[29].mxu1  ;;  %4278 = vmatmul.mubr.msk.f32.vlgmr.msra.gmra.mrb[20].mxu0 %vm2217_vm1, %v2782_v46 }
 0x53d   : > { %4591 = vmatpush3.bf16.msra.mxu0 %v4590_v45  ;;  %4284 = vmatprep.mubr.msk.f32.mxu0 %vm4691_vm0, %v4692_v42  ;;  %v3491_v42 = vld [vmem:[%s559_s24] ss:$0 sm:$0xff] }
 0x53f   : > { %v2855_v48 = vpop.f32.mrb[30].mxu1 }
 0x540   : > { %v4258_v49 = vpop.f32.mrb[31].mxu1 }
 0x544   : > { %4285 = vmatmul.mubr.msk.f32.vlgmr.msra.gmra.mrb[20].mxu0 %vm2217_vm1, %v2855_v48 }
 0x5ef   : > { %v2936_v50 = vpop.f32.mrb[32].mxu1 }
 0x5f0   : > { %v4265_v51 = vpop.f32.mrb[33].mxu1 }
 0x617   : > { %v3155_v52 = vpop.f32.mrb[20].mxu0 }
 0x618   : > { %v4592_v62 = vadd.f32 %v3155_v52, %v2936_v50  ;;  %v4286_v53 = vpop.f32.mrb[21].mxu0 }
 0x61a   : > { %4288 = vmatpush3.msra.mxu1 %v4592_v62 }
 0x61b   : > { %4290 = vmatmul.mubr.msk.f32.vlgmr.msra.gmra.mrb[34].mxu1 %vm2522_vm2, %v3162_v54 }
 0x6ee   : > { %v3239_v55 = vpop.f32.mrb[34].mxu1 }
 0x6ef   : > { %v3240_v56 = vadd.f32 %v3491_v42, %v3239_v55  ;;  %v4291_v57 = vpop.f32.mrb[35].mxu1 }
 0x6f1   : > { %v3244_v58 = vsel %vm3243_vm3, %v3240_v56, -inf }
 0x6f2   : > { %3245 = vmax.xlane.f32.xlu0 %v3244_v58 }
 0x77f   : > { %v3246_v59 = vpop.xlane.xlu0 %3245 }
 0x780   : > { %v3247_v60 = vsub.f32 %v3240_v56, %v3246_v59 }
 0x782   : > { %v3248_v61 = vmul.f32 1.442695, %v3247_v60 }
 0x784   : > { %4678 = vpow2.f32 %v3248_v61 }
 0x78e   : > { %v4679_v63 = vpop.eup %4678 }
 0x78f   : > { %v3250_v0 = vsel %vm3243_vm3, %v4679_v63, 0.0 }
 0x790   : > { %3251 = vadd.xlane.f32.xlu1 %v3250_v0 }
 0x81d   : > { %v3252_v1 = vpop.xlane.xlu1 %3251 }
 0x81e   : > { %4680 = vlog2.f32 %v3252_v1 }
 0x828   : > { %v4681_v5 = vpop.eup %4680 }
 0x829   : > { %v3254_v2 = vmul.f32 0.6931472, %v4681_v5 }
 0x82b   : > { %v3255_v3 = vsub.f32 %v3247_v60, %v3254_v2 }
 0x82d   : > { %3256 = vst [vmem:[%s563_s30] sm:$0x3] %v3255_v3 }
 0x82e PF: > { %s23_s25 = sadd.s32 1, %s4688_s25  }
 0x82f   : > { %p20_p4 = scmp.ge.s32.totalorder %s23_s25, 4  }
 0x831   :  { %22 = sbr.rel (!%p20_p4) target bundleno = 1 (0x1), region = 123 }

</bundles_post_ra>
